<compile_context>
chip_gen: v5e
topology: v5e:2x2
jax: 0.10.0
libtpu: 0.0.40
codegen_flags: <defaults>
</compile_context>

<pallas_src>
import jax
import jax.numpy as jnp
from jax.experimental import pallas as pl
from jax.experimental.pallas import tpu as pltpu

CIN, COUT = 256, 512
H, W = 14, 14
KH, KW = 3, 3
HOUT, WOUT = 7, 7                # floor((14 + 2*1 - 3)/2) + 1
HP, WP = H + 2, W + 2            # padded spatial = 16 x 16
NROWS = (HP // 2) * (WP // 2)    # 64 flat rows per phase plane (8x8 padded output grid)
ZROWS = 80                       # 64 valid rows + 16 zero rows so shifted tap reads stay in-bounds
KDIM = KH * KW * CIN             # 2304 = im2col contraction dimension
NBLK = 4                         # grid over COUT blocks
CBLK = COUT // NBLK              # 128


def _fused_add_relu_conv_kernel(ab_ref, w_ref, o_ref, z_ref, im_ref):
    # ab_ref: [2, 4, NROWS, CIN] f32   (x48/x43 stacked, phase-decomposed padded inputs)
    # w_ref:  [1, KDIM, CBLK]    bf16  (block-contiguous im2col weights, one COUT block)
    # o_ref:  [NROWS, CBLK]      f32   (flattened 8x8 padded output grid, one COUT block)
    # z_ref:  [4, ZROWS, CIN]    bf16  scratch: relu(a + b) phase planes + zero tail
    # im_ref: [NROWS, KDIM]      bf16  scratch: im2col matrix, built once, reused per block

    # Build the activation scratch ONCE; with ("arbitrary",) semantics the grid runs
    # sequentially on one TensorCore and scratch persists across grid steps.
    @pl.when(pl.program_id(0) == 0)
    def _():
        for t in range(4):
            z = jnp.maximum(ab_ref[0, t] + ab_ref[1, t], 0.0)          # f32 add + ReLU
            z_ref[t, :NROWS, :] = z.astype(jnp.bfloat16)                # single f32->bf16 cast
            z_ref[t, NROWS:, :] = jnp.zeros((ZROWS - NROWS, CIN), jnp.bfloat16)
        # Stride-2 3x3 conv via phase planes:
        #   padded[2*oh+kh, 2*ow+kw] == plane[2*(kh%2)+(kw%2)] flat row (8*oh+ow) + shift,
        #   shift = 8*(kh//2) + (kw//2).  Rows past 63 read the zero tail; the "phantom"
        #   taps for oh==7 / ow==7 only affect outputs cropped away by the [:7,:7] crop.
        for kh in range(KH):
            for kw in range(KW):
                plane = 2 * (kh % 2) + (kw % 2)
                shift = 8 * (kh // 2) + (kw // 2)
                tap = KW * kh + kw
                im_ref[:, tap * CIN:(tap + 1) * CIN] = z_ref[plane, pl.ds(shift, NROWS), :]

    # One MXU matmul per COUT block: [64, 2304] x [2304, 128], bf16 operands, f32 acc.
    o_ref[...] = jnp.dot(im_ref[...], w_ref[0], preferred_element_type=jnp.float32)


def prepare_weight(weight):
    """OIHW [COUT, CIN, 3, 3] f32 -> block-contiguous im2col [NBLK, 9*CIN, CBLK] bf16.

    Row order of the contraction dim is tap-major then CIN, matching the im2col
    scratch columns.  Call ONCE at parameter-load time (off the hot path)."""
    w = jnp.transpose(weight, (2, 3, 1, 0))              # [KH, KW, CIN, COUT]
    w = w.reshape(KDIM, COUT).astype(jnp.bfloat16)       # [2304, 512]
    w = w.reshape(KDIM, NBLK, CBLK)
    return jnp.transpose(w, (1, 0, 2))                   # [NBLK, 2304, CBLK], block-contiguous


def _space_to_depth(x):
    # x: [B, CIN, H, W] -> [B, 4, NROWS, CIN]; plane index = 2*(row%2) + (col%2)
    # of the zero-padded 16x16 image, flat row = 8*(row//2) + (col//2).
    hwc = jnp.transpose(x, (0, 2, 3, 1))                        # [B, H, W, CIN]
    hwc = jnp.pad(hwc, ((0, 0), (1, 1), (1, 1), (0, 0)))        # [B, HP, WP, CIN]
    x6 = hwc.reshape(-1, HP // 2, 2, WP // 2, 2, CIN)
    x6 = jnp.transpose(x6, (0, 2, 4, 1, 3, 5))                  # [B, 2, 2, 8, 8, CIN]
    return x6.reshape(-1, 4, NROWS, CIN)


@jax.jit
def fused_add_relu_conv2d(x48, x43, w_prepped):
    """x48, x43: [1, CIN, 14, 14] f32; w_prepped = prepare_weight(weight).
    Returns [1, COUT, 7, 7] == conv2d(relu(x48 + x43), stride 2, pad 1, no bias)."""
    xs = jnp.concatenate([x48, x43], axis=0)       # [2, CIN, H, W]
    ab = _space_to_depth(xs)                        # [2, 4, NROWS, CIN]  (one fused XLA op)

    out_flat = pl.pallas_call(
        _fused_add_relu_conv_kernel,
        out_shape=jax.ShapeDtypeStruct((NROWS, COUT), jnp.float32),
        grid=(NBLK,),
        in_specs=[
            pl.BlockSpec((2, 4, NROWS, CIN), lambda j: (0, 0, 0, 0)),
            pl.BlockSpec((1, KDIM, CBLK), lambda j: (j, 0, 0)),
        ],
        out_specs=pl.BlockSpec((NROWS, CBLK), lambda j: (0, j)),
        scratch_shapes=[
            pltpu.VMEM((4, ZROWS, CIN), jnp.bfloat16),     # relu(a+b) phase planes
            pltpu.VMEM((NROWS, KDIM), jnp.bfloat16),       # im2col matrix
        ],
        compiler_params=pltpu.CompilerParams(
            dimension_semantics=("arbitrary",)),           # scratch reused across steps
    )(ab, w_prepped)

    out = out_flat.reshape(8, 8, COUT)[:HOUT, :WOUT, :]    # crop padded 8x8 grid -> 7x7
    return jnp.transpose(out, (2, 0, 1))[None]             # [1, COUT, 7, 7]


if __name__ == "__main__":
    key = jax.random.PRNGKey(0)
    k1, k2, k3 = jax.random.split(key, 3)

    # Shapes implied by the module: x48, x43 of [1, 256, 14, 14].
    x48 = jax.random.normal(k1, (1, CIN, H, W), jnp.float32)
    x43 = jax.random.normal(k2, (1, CIN, H, W), jnp.float32)
    # Deterministic synthetic weights for Conv2d(256, 512, 3, stride=2, pad=1, bias=False).
    weight = jax.random.normal(k3, (COUT, CIN, KH, KW), jnp.float32) * 0.05

    # Weight prep happens once, off the per-call hot path.
    w_prepped = jax.block_until_ready(prepare_weight(weight))

    out = fused_add_relu_conv2d(x48, x43, w_prepped)
    out = jax.block_until_ready(out)

    # Plain-XLA f32 reference for the same semantics.
    ref = jax.lax.conv_general_dilated(
        jnp.maximum(x48 + x43, 0.0), weight,
        window_strides=(2, 2), padding=((1, 1), (1, 1)),
        dimension_numbers=("NCHW", "OIHW", "NCHW"))

    assert out.shape == (1, COUT, HOUT, WOUT), out.shape
    # bf16 MXU operands + f32 accumulation -> widened tolerance vs pure-f32 reference.
    assert jnp.allclose(out, ref, atol=2e-1, rtol=2e-2), float(jnp.max(jnp.abs(out - ref)))
    print("KERNEL_OK")
</pallas_src>

<mosaic_0001>
module attributes {stable_mosaic.version = 11 : i64} {
  func.func @_fused_add_relu_conv_kernel(%arg0: i32, %arg1: memref<2x4x64x256xf32, #tpu.memory_space<vmem>>, %arg2: memref<1x2304x128xbf16, #tpu.memory_space<vmem>>, %arg3: memref<64x128xf32, #tpu.memory_space<vmem>>, %arg4: memref<4x80x256xbf16, #tpu.memory_space<vmem>>, %arg5: memref<64x2304xbf16, #tpu.memory_space<vmem>>) attributes {dimension_semantics = [#tpu.dimension_semantics<arbitrary>], iteration_bounds = array<i64: 4>, scalar_prefetch = 0 : i64, scratch_operands = 2 : i64, tpu.core_type = #tpu.core_type<tc>, window_params = [{pipeline_mode = #tpu.pipeline_mode<synchronous>, transform_indices = @transform_0, window_bounds = array<i64: 2, 4, 64, 256>}, {transform_indices = @transform_1, window_bounds = array<i64: 1, 2304, 128>}, {transform_indices = @transform_2, window_bounds = array<i64: 64, 128>}]} {
    %c0_i32 = arith.constant 0 : i32
    %0 = arith.cmpi eq, %arg0, %c0_i32 : i32
    %1 = arith.extui %0 : i1 to i32
    %c0_i32_0 = arith.constant 0 : i32
    %2 = arith.cmpi ne, %1, %c0_i32_0 : i32
    scf.if %2 {
      %c0_7 = arith.constant 0 : index
      %c0_8 = arith.constant 0 : index
      %c0_9 = arith.constant 0 : index
      %c0_10 = arith.constant 0 : index
      %8 = vector.load %arg1[%c0_7, %c0_8, %c0_9, %c0_10] : memref<2x4x64x256xf32, #tpu.memory_space<vmem>>, vector<1x1x64x256xf32>
      %9 = vector.shape_cast %8 : vector<1x1x64x256xf32> to vector<64x256xf32>
      %c1 = arith.constant 1 : index
      %c0_11 = arith.constant 0 : index
      %c0_12 = arith.constant 0 : index
      %c0_13 = arith.constant 0 : index
      %10 = vector.load %arg1[%c1, %c0_11, %c0_12, %c0_13] : memref<2x4x64x256xf32, #tpu.memory_space<vmem>>, vector<1x1x64x256xf32>
      %11 = vector.shape_cast %10 : vector<1x1x64x256xf32> to vector<64x256xf32>
      %12 = arith.addf %9, %11 : vector<64x256xf32>
      %cst_14 = arith.constant 0.000000e+00 : f32
      %13 = vector.broadcast %cst_14 : f32 to vector<64x256xf32>
      %14 = arith.maximumf %12, %13 : vector<64x256xf32>
      %15 = arith.truncf %14 : vector<64x256xf32> to vector<64x256xbf16>
      %c0_15 = arith.constant 0 : index
      %c0_16 = arith.constant 0 : index
      %c0_17 = arith.constant 0 : index
      %16 = vector.load %arg4[%c0_15, %c0_16, %c0_17] : memref<4x80x256xbf16, #tpu.memory_space<vmem>>, vector<1x64x256xbf16>
      %17 = vector.shape_cast %16 : vector<1x64x256xbf16> to vector<64x256xbf16>
      %18 = vector.shape_cast %15 : vector<64x256xbf16> to vector<1x64x256xbf16>
      tpu.vector_store %arg4[%c0_15, %c0_16, %c0_17], %18 {strides = array<i32>} : memref<4x80x256xbf16, #tpu.memory_space<vmem>>, vector<1x64x256xbf16>,
      %cst_18 = arith.constant 0.000000e+00 : bf16
      %19 = vector.broadcast %cst_18 : bf16 to vector<16x256xbf16>
      %c0_19 = arith.constant 0 : index
      %c64 = arith.constant 64 : index
      %c0_20 = arith.constant 0 : index
      %20 = vector.load %arg4[%c0_19, %c64, %c0_20] : memref<4x80x256xbf16, #tpu.memory_space<vmem>>, vector<1x16x256xbf16>
      %21 = vector.shape_cast %20 : vector<1x16x256xbf16> to vector<16x256xbf16>
      %22 = vector.shape_cast %19 : vector<16x256xbf16> to vector<1x16x256xbf16>
      tpu.vector_store %arg4[%c0_19, %c64, %c0_20], %22 {strides = array<i32>} : memref<4x80x256xbf16, #tpu.memory_space<vmem>>, vector<1x16x256xbf16>,
      %c0_21 = arith.constant 0 : index
      %c1_22 = arith.constant 1 : index
      %c0_23 = arith.constant 0 : index
      %c0_24 = arith.constant 0 : index
      %23 = vector.load %arg1[%c0_21, %c1_22, %c0_23, %c0_24] : memref<2x4x64x256xf32, #tpu.memory_space<vmem>>, vector<1x1x64x256xf32>
      %24 = vector.shape_cast %23 : vector<1x1x64x256xf32> to vector<64x256xf32>
      %c1_25 = arith.constant 1 : index
      %c1_26 = arith.constant 1 : index
      %c0_27 = arith.constant 0 : index
      %c0_28 = arith.constant 0 : index
      %25 = vector.load %arg1[%c1_25, %c1_26, %c0_27, %c0_28] : memref<2x4x64x256xf32, #tpu.memory_space<vmem>>, vector<1x1x64x256xf32>
      %26 = vector.shape_cast %25 : vector<1x1x64x256xf32> to vector<64x256xf32>
      %27 = arith.addf %24, %26 : vector<64x256xf32>
      %cst_29 = arith.constant 0.000000e+00 : f32
      %28 = vector.broadcast %cst_29 : f32 to vector<64x256xf32>
      %29 = arith.maximumf %27, %28 : vector<64x256xf32>
      %30 = arith.truncf %29 : vector<64x256xf32> to vector<64x256xbf16>
      %c1_30 = arith.constant 1 : index
      %c0_31 = arith.constant 0 : index
      %c0_32 = arith.constant 0 : index
      %31 = vector.load %arg4[%c1_30, %c0_31, %c0_32] : memref<4x80x256xbf16, #tpu.memory_space<vmem>>, vector<1x64x256xbf16>
      %32 = vector.shape_cast %31 : vector<1x64x256xbf16> to vector<64x256xbf16>
      %33 = vector.shape_cast %30 : vector<64x256xbf16> to vector<1x64x256xbf16>
      tpu.vector_store %arg4[%c1_30, %c0_31, %c0_32], %33 {strides = array<i32>} : memref<4x80x256xbf16, #tpu.memory_space<vmem>>, vector<1x64x256xbf16>,
      %cst_33 = arith.constant 0.000000e+00 : bf16
      %34 = vector.broadcast %cst_33 : bf16 to vector<16x256xbf16>
      %c1_34 = arith.constant 1 : index
      %c64_35 = arith.constant 64 : index
      %c0_36 = arith.constant 0 : index
      %35 = vector.load %arg4[%c1_34, %c64_35, %c0_36] : memref<4x80x256xbf16, #tpu.memory_space<vmem>>, vector<1x16x256xbf16>
      %36 = vector.shape_cast %35 : vector<1x16x256xbf16> to vector<16x256xbf16>
      %37 = vector.shape_cast %34 : vector<16x256xbf16> to vector<1x16x256xbf16>
      tpu.vector_store %arg4[%c1_34, %c64_35, %c0_36], %37 {strides = array<i32>} : memref<4x80x256xbf16, #tpu.memory_space<vmem>>, vector<1x16x256xbf16>,
      %c0_37 = arith.constant 0 : index
      %c2 = arith.constant 2 : index
      %c0_38 = arith.constant 0 : index
      %c0_39 = arith.constant 0 : index
      %38 = vector.load %arg1[%c0_37, %c2, %c0_38, %c0_39] : memref<2x4x64x256xf32, #tpu.memory_space<vmem>>, vector<1x1x64x256xf32>
      %39 = vector.shape_cast %38 : vector<1x1x64x256xf32> to vector<64x256xf32>
      %c1_40 = arith.constant 1 : index
      %c2_41 = arith.constant 2 : index
      %c0_42 = arith.constant 0 : index
      %c0_43 = arith.constant 0 : index
      %40 = vector.load %arg1[%c1_40, %c2_41, %c0_42, %c0_43] : memref<2x4x64x256xf32, #tpu.memory_space<vmem>>, vector<1x1x64x256xf32>
      %41 = vector.shape_cast %40 : vector<1x1x64x256xf32> to vector<64x256xf32>
      %42 = arith.addf %39, %41 : vector<64x256xf32>
      %cst_44 = arith.constant 0.000000e+00 : f32
      %43 = vector.broadcast %cst_44 : f32 to vector<64x256xf32>
      %44 = arith.maximumf %42, %43 : vector<64x256xf32>
      %45 = arith.truncf %44 : vector<64x256xf32> to vector<64x256xbf16>
      %c2_45 = arith.constant 2 : index
      %c0_46 = arith.constant 0 : index
      %c0_47 = arith.constant 0 : index
      %46 = vector.load %arg4[%c2_45, %c0_46, %c0_47] : memref<4x80x256xbf16, #tpu.memory_space<vmem>>, vector<1x64x256xbf16>
      %47 = vector.shape_cast %46 : vector<1x64x256xbf16> to vector<64x256xbf16>
      %48 = vector.shape_cast %45 : vector<64x256xbf16> to vector<1x64x256xbf16>
      tpu.vector_store %arg4[%c2_45, %c0_46, %c0_47], %48 {strides = array<i32>} : memref<4x80x256xbf16, #tpu.memory_space<vmem>>, vector<1x64x256xbf16>,
      %cst_48 = arith.constant 0.000000e+00 : bf16
      %49 = vector.broadcast %cst_48 : bf16 to vector<16x256xbf16>
      %c2_49 = arith.constant 2 : index
      %c64_50 = arith.constant 64 : index
      %c0_51 = arith.constant 0 : index
      %50 = vector.load %arg4[%c2_49, %c64_50, %c0_51] : memref<4x80x256xbf16, #tpu.memory_space<vmem>>, vector<1x16x256xbf16>
      %51 = vector.shape_cast %50 : vector<1x16x256xbf16> to vector<16x256xbf16>
      %52 = vector.shape_cast %49 : vector<16x256xbf16> to vector<1x16x256xbf16>
      tpu.vector_store %arg4[%c2_49, %c64_50, %c0_51], %52 {strides = array<i32>} : memref<4x80x256xbf16, #tpu.memory_space<vmem>>, vector<1x16x256xbf16>,
      %c0_52 = arith.constant 0 : index
      %c3 = arith.constant 3 : index
      %c0_53 = arith.constant 0 : index
      %c0_54 = arith.constant 0 : index
      %53 = vector.load %arg1[%c0_52, %c3, %c0_53, %c0_54] : memref<2x4x64x256xf32, #tpu.memory_space<vmem>>, vector<1x1x64x256xf32>
      %54 = vector.shape_cast %53 : vector<1x1x64x256xf32> to vector<64x256xf32>
      %c1_55 = arith.constant 1 : index
      %c3_56 = arith.constant 3 : index
      %c0_57 = arith.constant 0 : index
      %c0_58 = arith.constant 0 : index
      %55 = vector.load %arg1[%c1_55, %c3_56, %c0_57, %c0_58] : memref<2x4x64x256xf32, #tpu.memory_space<vmem>>, vector<1x1x64x256xf32>
      %56 = vector.shape_cast %55 : vector<1x1x64x256xf32> to vector<64x256xf32>
      %57 = arith.addf %54, %56 : vector<64x256xf32>
      %cst_59 = arith.constant 0.000000e+00 : f32
      %58 = vector.broadcast %cst_59 : f32 to vector<64x256xf32>
      %59 = arith.maximumf %57, %58 : vector<64x256xf32>
      %60 = arith.truncf %59 : vector<64x256xf32> to vector<64x256xbf16>
      %c3_60 = arith.constant 3 : index
      %c0_61 = arith.constant 0 : index
      %c0_62 = arith.constant 0 : index
      %61 = vector.load %arg4[%c3_60, %c0_61, %c0_62] : memref<4x80x256xbf16, #tpu.memory_space<vmem>>, vector<1x64x256xbf16>
      %62 = vector.shape_cast %61 : vector<1x64x256xbf16> to vector<64x256xbf16>
      %63 = vector.shape_cast %60 : vector<64x256xbf16> to vector<1x64x256xbf16>
      tpu.vector_store %arg4[%c3_60, %c0_61, %c0_62], %63 {strides = array<i32>} : memref<4x80x256xbf16, #tpu.memory_space<vmem>>, vector<1x64x256xbf16>,
      %cst_63 = arith.constant 0.000000e+00 : bf16
      %64 = vector.broadcast %cst_63 : bf16 to vector<16x256xbf16>
      %c3_64 = arith.constant 3 : index
      %c64_65 = arith.constant 64 : index
      %c0_66 = arith.constant 0 : index
      %65 = vector.load %arg4[%c3_64, %c64_65, %c0_66] : memref<4x80x256xbf16, #tpu.memory_space<vmem>>, vector<1x16x256xbf16>
      %66 = vector.shape_cast %65 : vector<1x16x256xbf16> to vector<16x256xbf16>
      %67 = vector.shape_cast %64 : vector<16x256xbf16> to vector<1x16x256xbf16>
      tpu.vector_store %arg4[%c3_64, %c64_65, %c0_66], %67 {strides = array<i32>} : memref<4x80x256xbf16, #tpu.memory_space<vmem>>, vector<1x16x256xbf16>,
      %c0_67 = arith.constant 0 : index
      %c0_68 = arith.constant 0 : index
      %c0_69 = arith.constant 0 : index
      %68 = vector.load %arg4[%c0_67, %c0_68, %c0_69] : memref<4x80x256xbf16, #tpu.memory_space<vmem>>, vector<1x64x256xbf16>
      %69 = vector.shape_cast %68 : vector<1x64x256xbf16> to vector<64x256xbf16>
      %c0_70 = arith.constant 0 : index
      %c0_71 = arith.constant 0 : index
      %70 = vector.load %arg5[%c0_70, %c0_71] : memref<64x2304xbf16, #tpu.memory_space<vmem>>, vector<64x256xbf16>
      tpu.vector_store %arg5[%c0_70, %c0_71], %69 {strides = array<i32>} : memref<64x2304xbf16, #tpu.memory_space<vmem>>, vector<64x256xbf16>,
      %c1_72 = arith.constant 1 : index
      %c0_73 = arith.constant 0 : index
      %c0_74 = arith.constant 0 : index
      %71 = vector.load %arg4[%c1_72, %c0_73, %c0_74] : memref<4x80x256xbf16, #tpu.memory_space<vmem>>, vector<1x64x256xbf16>
      %72 = vector.shape_cast %71 : vector<1x64x256xbf16> to vector<64x256xbf16>
      %c0_75 = arith.constant 0 : index
      %c256 = arith.constant 256 : index
      %73 = vector.load %arg5[%c0_75, %c256] : memref<64x2304xbf16, #tpu.memory_space<vmem>>, vector<64x256xbf16>
      tpu.vector_store %arg5[%c0_75, %c256], %72 {strides = array<i32>} : memref<64x2304xbf16, #tpu.memory_space<vmem>>, vector<64x256xbf16>,
      %c0_76 = arith.constant 0 : index
      %c1_77 = arith.constant 1 : index
      %c0_78 = arith.constant 0 : index
      %74 = vector.load %arg4[%c0_76, %c1_77, %c0_78] : memref<4x80x256xbf16, #tpu.memory_space<vmem>>, vector<1x64x256xbf16>
      %75 = vector.shape_cast %74 : vector<1x64x256xbf16> to vector<64x256xbf16>
      %c0_79 = arith.constant 0 : index
      %c512 = arith.constant 512 : index
      %76 = vector.load %arg5[%c0_79, %c512] : memref<64x2304xbf16, #tpu.memory_space<vmem>>, vector<64x256xbf16>
      tpu.vector_store %arg5[%c0_79, %c512], %75 {strides = array<i32>} : memref<64x2304xbf16, #tpu.memory_space<vmem>>, vector<64x256xbf16>,
      %c2_80 = arith.constant 2 : index
      %c0_81 = arith.constant 0 : index
      %c0_82 = arith.constant 0 : index
      %77 = vector.load %arg4[%c2_80, %c0_81, %c0_82] : memref<4x80x256xbf16, #tpu.memory_space<vmem>>, vector<1x64x256xbf16>
      %78 = vector.shape_cast %77 : vector<1x64x256xbf16> to vector<64x256xbf16>
      %c0_83 = arith.constant 0 : index
      %c768 = arith.constant 768 : index
      %79 = vector.load %arg5[%c0_83, %c768] : memref<64x2304xbf16, #tpu.memory_space<vmem>>, vector<64x256xbf16>
      tpu.vector_store %arg5[%c0_83, %c768], %78 {strides = array<i32>} : memref<64x2304xbf16, #tpu.memory_space<vmem>>, vector<64x256xbf16>,
      %c3_84 = arith.constant 3 : index
      %c0_85 = arith.constant 0 : index
      %c0_86 = arith.constant 0 : index
      %80 = vector.load %arg4[%c3_84, %c0_85, %c0_86] : memref<4x80x256xbf16, #tpu.memory_space<vmem>>, vector<1x64x256xbf16>
      %81 = vector.shape_cast %80 : vector<1x64x256xbf16> to vector<64x256xbf16>
      %c0_87 = arith.constant 0 : index
      %c1024 = arith.constant 1024 : index
      %82 = vector.load %arg5[%c0_87, %c1024] : memref<64x2304xbf16, #tpu.memory_space<vmem>>, vector<64x256xbf16>
      tpu.vector_store %arg5[%c0_87, %c1024], %81 {strides = array<i32>} : memref<64x2304xbf16, #tpu.memory_space<vmem>>, vector<64x256xbf16>,
      %c2_88 = arith.constant 2 : index
      %c1_89 = arith.constant 1 : index
      %c0_90 = arith.constant 0 : index
      %83 = vector.load %arg4[%c2_88, %c1_89, %c0_90] : memref<4x80x256xbf16, #tpu.memory_space<vmem>>, vector<1x64x256xbf16>
      %84 = vector.shape_cast %83 : vector<1x64x256xbf16> to vector<64x256xbf16>
      %c0_91 = arith.constant 0 : index
      %c1280 = arith.constant 1280 : index
      %85 = vector.load %arg5[%c0_91, %c1280] : memref<64x2304xbf16, #tpu.memory_space<vmem>>, vector<64x256xbf16>
      tpu.vector_store %arg5[%c0_91, %c1280], %84 {strides = array<i32>} : memref<64x2304xbf16, #tpu.memory_space<vmem>>, vector<64x256xbf16>,
      %c0_92 = arith.constant 0 : index
      %c8 = arith.constant 8 : index
      %c0_93 = arith.constant 0 : index
      %86 = vector.load %arg4[%c0_92, %c8, %c0_93] : memref<4x80x256xbf16, #tpu.memory_space<vmem>>, vector<1x64x256xbf16>
      %87 = vector.shape_cast %86 : vector<1x64x256xbf16> to vector<64x256xbf16>
      %c0_94 = arith.constant 0 : index
      %c1536 = arith.constant 1536 : index
      %88 = vector.load %arg5[%c0_94, %c1536] : memref<64x2304xbf16, #tpu.memory_space<vmem>>, vector<64x256xbf16>
      tpu.vector_store %arg5[%c0_94, %c1536], %87 {strides = array<i32>} : memref<64x2304xbf16, #tpu.memory_space<vmem>>, vector<64x256xbf16>,
      %c1_95 = arith.constant 1 : index
      %c8_96 = arith.constant 8 : index
      %c0_97 = arith.constant 0 : index
      %89 = vector.load %arg4[%c1_95, %c8_96, %c0_97] : memref<4x80x256xbf16, #tpu.memory_space<vmem>>, vector<1x64x256xbf16>
      %90 = vector.shape_cast %89 : vector<1x64x256xbf16> to vector<64x256xbf16>
      %c0_98 = arith.constant 0 : index
      %c1792 = arith.constant 1792 : index
      %91 = vector.load %arg5[%c0_98, %c1792] : memref<64x2304xbf16, #tpu.memory_space<vmem>>, vector<64x256xbf16>
      tpu.vector_store %arg5[%c0_98, %c1792], %90 {strides = array<i32>} : memref<64x2304xbf16, #tpu.memory_space<vmem>>, vector<64x256xbf16>,
      %c0_99 = arith.constant 0 : index
      %c9 = arith.constant 9 : index
      %c0_100 = arith.constant 0 : index
      %92 = vector.load %arg4[%c0_99, %c9, %c0_100] : memref<4x80x256xbf16, #tpu.memory_space<vmem>>, vector<1x64x256xbf16>
      %93 = vector.shape_cast %92 : vector<1x64x256xbf16> to vector<64x256xbf16>
      %c0_101 = arith.constant 0 : index
      %c2048 = arith.constant 2048 : index
      %94 = vector.load %arg5[%c0_101, %c2048] : memref<64x2304xbf16, #tpu.memory_space<vmem>>, vector<64x256xbf16>
      tpu.vector_store %arg5[%c0_101, %c2048], %93 {strides = array<i32>} : memref<64x2304xbf16, #tpu.memory_space<vmem>>, vector<64x256xbf16>,
    } else {
    }
    %c0 = arith.constant 0 : index
    %c0_1 = arith.constant 0 : index
    %3 = vector.load %arg5[%c0, %c0_1] : memref<64x2304xbf16, #tpu.memory_space<vmem>>, vector<64x2304xbf16>
    %c0_2 = arith.constant 0 : index
    %c0_3 = arith.constant 0 : index
    %c0_4 = arith.constant 0 : index
    %4 = vector.load %arg2[%c0_2, %c0_3, %c0_4] : memref<1x2304x128xbf16, #tpu.memory_space<vmem>>, vector<1x2304x128xbf16>
    %5 = vector.shape_cast %4 : vector<1x2304x128xbf16> to vector<2304x128xbf16>
    %cst = arith.constant dense<0.000000e+00> : vector<64x128xf32>
    %6 = tpu.matmul %3, %5, %cst {dimension_numbers = #tpu.dot_dimension_numbers<[1], [0], [0], [1], [0, 0, 1, 1], [], []>} : vector<64x2304xbf16>, vector<2304x128xbf16>, vector<64x128xf32> -> vector<64x128xf32>
    %c0_5 = arith.constant 0 : index
    %c0_6 = arith.constant 0 : index
    %7 = vector.load %arg3[%c0_5, %c0_6] : memref<64x128xf32, #tpu.memory_space<vmem>>, vector<64x128xf32>
    tpu.vector_store %arg3[%c0_5, %c0_6], %6 {strides = array<i32>} : memref<64x128xf32, #tpu.memory_space<vmem>>, vector<64x128xf32>,
    return
  }
  func.func @transform_0(%arg0: i32) -> (i32, i32, i32, i32) {
    %c0_i32 = arith.constant 0 : i32
    %c0_i32_0 = arith.constant 0 : i32
    %c0_i32_1 = arith.constant 0 : i32
    %c0_i32_2 = arith.constant 0 : i32
    %c0_i32_3 = arith.constant 0 : i32
    return %c0_i32, %c0_i32_0, %c0_i32_1, %c0_i32_2 : i32, i32, i32, i32
  }
  func.func @transform_1(%arg0: i32) -> (i32, i32, i32) {
    %c0_i32 = arith.constant 0 : i32
    %c0_i32_0 = arith.constant 0 : i32
    %c0_i32_1 = arith.constant 0 : i32
    return %arg0, %c0_i32, %c0_i32_0 : i32, i32, i32
  }
  func.func @transform_2(%arg0: i32) -> (i32, i32) {
    %c0_i32 = arith.constant 0 : i32
    %c0_i32_0 = arith.constant 0 : i32
    return %c0_i32, %arg0 : i32, i32
  }
}

</mosaic_0001>

<bundles_post_ra>
// kernel: fused_add_relu_conv2d.1
= control target key start
LH: loop header
LB: loop body
LE: loop exit
PB: predicated region body
PF: predicated region fallthrough
CT: control target
= control target key end

     0   :  { %s4428_s9 = smov 0   ;;  %s4430_s10 = smov 0   ;;  %s5460_s0 = inlined_call_operand.vmem [shape: f32[2,4,64,256], index: 0, kind: input, shape index: {}]   ;;  %s5461_s1 = inlined_call_operand.vmem [shape: bf16[4,2304,128], index: 1, kind: input, shape index: {}]   ;;  %s5462_s2 = inlined_call_operand.vmem [shape: f32[64,512], index: 2, kind: output, shape index: {}]  }
   0x1   :  { %s4432_s11 = smov 0  }
   0x2 LB: > { %s4439_s12 = sadd.s32 4294967295, %s4410_s11   ;;  %s4441_s13 = sadd.s32 1, %s4410_s11   ;;  %s4410_s11 = sphi %s4432_s11, %s5468_s11   ;;  %s4406_s10 = sphi %s4430_s10, %s5467_s10   ;;  %s4402_s9 = sphi %s4428_s9, %s5466_s9  }
   0x3   : > { %s63_s14 = ssub.s32 %s4410_s11, %s4441_s13  ;;  %s66_s15 = sadd.s32 1, %s4406_s10 }
   0x4   : > { %p64_p0 = scmp.eq.s32.totalorder %s63_s14, 0  ;;  %p76_p1 = scmp.ne.s32.totalorder %s4406_s10, %s4402_s9 }
   0x5   : > { %p77_p2 = scmp.eq.s32.totalorder %s4439_s12, 3  ;;  %p3145_p3 = scmp.ge.s32.totalorder %s4410_s11, 1 }
   0x6   : > { %s4448_s16 = scalar_select %p64_p0, %s4406_s10, %s66_s15  }
   0x7   : > { %p4450_p4 = por %p77_p2, %p76_p1  ;;  %p112_p5 = scmp.lt.s32.totalorder %s4410_s11, 5 }
   0x9   : > { %p113_p6 = pnand %p3145_p3, %p112_p5 }
   0xa   : > { %s130_s18 = sand.u32 (!%p113_p6), 1, %s4402_s9   ;;  %p133_p7 = scmp.lt.s32.totalorder (!%p113_p6), %s4439_s12, 3 }
   0xb   : > { %116 = sbr.rel (%p113_p6) target bundleno = 578 (0x242), region = 28  ;;  %s3146_s19 = sshll.u32 (!%p113_p6), %s130_s18, 6 }
   0xc   : > { %s4461_s25 = scalar_lea.vmem (!%p113_p6), [#allocation4], %s3146_s19  ;;  %p3148_p8 = scmp.ne.s32.totalorder (!%p113_p6), %s4439_s12, 0 }
  0x10   : > { %s134_s20 = scalar_select %p133_p7, %s4439_s12, 3 }
  0x11   : > { %142 = sbr.rel (%p3148_p8) target bundleno = 117 (0x75), region = 32 }
  0x12   : > { %s4361_s21 = smul.u32 1152, %s134_s20 }
  0x14   : > { %s4459_s24 = scalar_lea.vmem %s5461_s1, %s4361_s21 }
  0x16   : > { %v143_v0 = vld [vmem:[%s5460_s0] sm:$0xff]  ;;  %v144_v1 = vld [vmem:[%s5460_s0 + $0x8] sm:$0xff]  ;;  %v145_v5 = vld [vmem:[%s5460_s0 + $0x10] sm:$0xff]  ;;  %v4412_v7 = vmov 0   ;;  %vm522_vm0 = vsmask.f32 3328 }
  0x17   : > { %v3149_v2 = vld [vmem:[%s5460_s0 + $0x200] sm:$0xff]  ;;  %v3150_v3 = vld [vmem:[%s5460_s0 + $0x208] sm:$0xff]  ;;  %v146_v6 = vld [vmem:[%s5460_s0 + $0x18] sm:$0xff]  ;;  %224 = vst [vmem:[#allocation2 + $0x80] sm:$0xff] %v4412_v7  ;;  %vm523_vm1 = vsmask.f32 7440 }
  0x18   : > { %v176_v4 = vadd.f32 %v3149_v2, %v143_v0  ;;  %v177_v8 = vadd.f32 %v3150_v3, %v144_v1  ;;  %v3151_v9 = vld [vmem:[%s5460_s0 + $0x210] sm:$0xff]  ;;  %v3152_v10 = vld [vmem:[%s5460_s0 + $0x218] sm:$0xff]  ;;  %v147_v11 = vld [vmem:[%s5460_s0 + $0x20] sm:$0xff]  ;;  %225 = vst [vmem:[#allocation2 + $0x108] sm:$0xff] %v4412_v7 }
  0x19   : > { %v178_v13 = vadd.f32 %v3151_v9, %v145_v5  ;;  %v179_v14 = vadd.f32 %v3152_v10, %v146_v6  ;;  %v148_v15 = vld [vmem:[%s5460_s0 + $0x28] sm:$0xff]  ;;  %v3153_v16 = vld [vmem:[%s5460_s0 + $0x220] sm:$0xff]  ;;  %v149_v21 = vld [vmem:[%s5460_s0 + $0x30] sm:$0xff]  ;;  %394 = vst [vmem:[#allocation2 + $0x68] sm:$0xff] %v4412_v7 }
  0x1a   : > { %v192_v12 = vmax.f32 %v176_v4, 0.0  ;;  %v3154_v17 = vld [vmem:[%s5460_s0 + $0x228] sm:$0xff]  ;;  %v193_v18 = vmax.f32 %v177_v8, 0.0  ;;  %v180_v19 = vadd.f32 %v3153_v16, %v147_v11  ;;  %v150_v22 = vld [vmem:[%s5460_s0 + $0x38] sm:$0xff]  ;;  %v3155_v23 = vld [vmem:[%s5460_s0 + $0x230] sm:$0xff]  ;;  %781 = vst [vmem:[#allocation3 + $0x228] sm:$0xff] %v4412_v7 }
  0x1b   : > { %v181_v20 = vadd.f32 %v3154_v17, %v148_v15  ;;  %v194_v24 = vmax.f32 %v178_v13, 0.0  ;;  %v195_v25 = vmax.f32 %v179_v14, 0.0  ;;  %v3156_v26 = vld [vmem:[%s5460_s0 + $0x238] sm:$0xff]  ;;  %v182_v27 = vadd.f32 %v3155_v23, %v149_v21  ;;  %v151_v28 = vld [vmem:[%s5460_s0 + $0x40] sm:$0xff]  ;;  %v152_v29 = vld [vmem:[%s5460_s0 + $0x48] sm:$0xff] }
  0x1c   : > { %v4521_v30 = vpack.c.bf16 %v193_v18, %v192_v12  ;;  %v196_v31 = vmax.f32 %v180_v19, 0.0  ;;  %v183_v33 = vadd.f32 %v3156_v26, %v150_v22  ;;  %v3157_v34 = vld [vmem:[%s5460_s0 + $0x240] sm:$0xff]  ;;  %v3158_v35 = vld [vmem:[%s5460_s0 + $0x248] sm:$0xff]  ;;  %v153_v36 = vld [vmem:[%s5460_s0 + $0x50] sm:$0xff] }
  0x1d   : > { %v197_v32 = vmax.f32 %v181_v20, 0.0  ;;  %v4532_v37 = vpack.c.bf16 %v195_v25, %v194_v24  ;;  %v198_v38 = vmax.f32 %v182_v27, 0.0  ;;  %v184_v39 = vadd.f32 %v3157_v34, %v151_v28  ;;  %v154_v41 = vld [vmem:[%s5460_s0 + $0x58] sm:$0xff]  ;;  %v3159_v42 = vld [vmem:[%s5460_s0 + $0x250] sm:$0xff]  ;;  %v155_v48 = vld [vmem:[%s5460_s0 + $0x60] sm:$0xff] }
  0x1e   : > { %v185_v40 = vadd.f32 %v3158_v35, %v152_v29  ;;  %v3160_v43 = vld [vmem:[%s5460_s0 + $0x258] sm:$0xff]  ;;  %v199_v45 = vmax.f32 %v183_v33, 0.0  ;;  %v186_v46 = vadd.f32 %v3159_v42, %v153_v36  ;;  %v156_v49 = vld [vmem:[%s5460_s0 + $0x68] sm:$0xff]  ;;  %v3161_v50 = vld [vmem:[%s5460_s0 + $0x260] sm:$0xff]  ;;  %489 = vst [vmem:[#allocation3] sm:$0xff] %v4521_v30 }
  0x1f   : > { %v4543_v44 = vpack.c.bf16 %v197_v32, %v196_v31  ;;  %v187_v47 = vadd.f32 %v3160_v43, %v154_v41  ;;  %217 = vst [vmem:[#allocation2 + $0xd0] sm:$0xff] %v4532_v37  ;;  %v200_v51 = vmax.f32 %v184_v39, 0.0  ;;  %v3162_v53 = vld [vmem:[%s5460_s0 + $0x268] sm:$0xff]  ;;  %v188_v54 = vadd.f32 %v3161_v50, %v155_v48  ;;  %v157_v55 = vld [vmem:[%s5460_s0 + $0x70] sm:$0xff]  ;;  %v158_v56 = vld [vmem:[%s5460_s0 + $0x78] sm:$0xff] }
  0x20   : > { %v201_v52 = vmax.f32 %v185_v40, 0.0  ;;  %v4565_v57 = vpack.c.bf16 %v199_v45, %v198_v38  ;;  %v202_v58 = vmax.f32 %v186_v46, 0.0  ;;  %v189_v60 = vadd.f32 %v3162_v53, %v156_v49  ;;  %v3163_v61 = vld [vmem:[%s5460_s0 + $0x270] sm:$0xff]  ;;  %v3164_v62 = vld [vmem:[%s5460_s0 + $0x278] sm:$0xff]  ;;  %v3197_v63 = vld [vmem:[%s5460_s0 + $0x100] sm:$0xff]  ;;  %490 = vst [vmem:[#allocation3 + $0x48] sm:$0xff] %v4532_v37 }
  0x21   : > { %218 = vst [vmem:[#allocation2 + $0x10] sm:$0xff] %v4543_v44  ;;  %v203_v59 = vmax.f32 %v187_v47, 0.0  ;;  %v204_v1 = vmax.f32 %v188_v54, 0.0  ;;  %v190_v2 = vadd.f32 %v3163_v61, %v157_v55  ;;  %v191_v3 = vadd.f32 %v3164_v62, %v158_v56  ;;  %v3198_v4 = vld [vmem:[%s5460_s0 + $0x108] sm:$0xff]  ;;  %v3213_v5 = vld [vmem:[%s5460_s0 + $0x300] sm:$0xff]  ;;  %v3199_v12 = vld [vmem:[%s5460_s0 + $0x110] sm:$0xff] }
  0x22   : > { %v4576_v0 = vpack.c.bf16 %v201_v52, %v200_v51  ;;  %v3214_v6 = vld [vmem:[%s5460_s0 + $0x308] sm:$0xff]  ;;  %219 = vst [vmem:[#allocation2 + $0x48] sm:$0xff] %v4565_v57  ;;  %v205_v9 = vmax.f32 %v189_v60, 0.0  ;;  %v345_v10 = vadd.f32 %v3213_v5, %v3197_v63  ;;  %v3200_v13 = vld [vmem:[%s5460_s0 + $0x118] sm:$0xff]  ;;  %v3215_v14 = vld [vmem:[%s5460_s0 + $0x310] sm:$0xff] }
  0x23   : > { %v4588_v8 = vpack.c.bf16 %v203_v59, %v202_v58  ;;  %v346_v11 = vadd.f32 %v3214_v6, %v3198_v4  ;;  %v206_v15 = vmax.f32 %v190_v2, 0.0  ;;  %v207_v16 = vmax.f32 %v191_v3, 0.0  ;;  %v3216_v17 = vld [vmem:[%s5460_s0 + $0x318] sm:$0xff]  ;;  %v3201_v19 = vld [vmem:[%s5460_s0 + $0x120] sm:$0xff]  ;;  %v3202_v20 = vld [vmem:[%s5460_s0 + $0x128] sm:$0xff]  ;;  %491 = vst [vmem:[#allocation3 + $0x90] sm:$0xff] %v4543_v44 }
  0x24   : > { %220 = vst [vmem:[#allocation2 + $0x120] sm:$0xff] %v4576_v0  ;;  %v347_v18 = vadd.f32 %v3215_v14, %v3199_v12  ;;  %v4610_v21 = vpack.c.bf16 %v205_v9, %v204_v1  ;;  %v361_v22 = vmax.f32 %v345_v10, 0.0  ;;  %v348_v24 = vadd.f32 %v3216_v17, %v3200_v13  ;;  %v3217_v25 = vld [vmem:[%s5460_s0 + $0x320] sm:$0xff]  ;;  %v3218_v26 = vld [vmem:[%s5460_s0 + $0x328] sm:$0xff]  ;;  %v3203_v27 = vld [vmem:[%s5460_s0 + $0x130] sm:$0xff] }
  0x25   : > { %221 = vst [vmem:[#allocation2 + $0x38] sm:$0xff] %v4588_v8  ;;  %v362_v23 = vmax.f32 %v346_v11, 0.0  ;;  %v4621_v28 = vpack.c.bf16 %v207_v16, %v206_v15  ;;  %v349_v31 = vadd.f32 %v3217_v25, %v3201_v19  ;;  %v350_v32 = vadd.f32 %v3218_v26, %v3202_v20  ;;  %v3204_v33 = vld [vmem:[%s5460_s0 + $0x138] sm:$0xff]  ;;  %v3219_v34 = vld [vmem:[%s5460_s0 + $0x330] sm:$0xff]  ;;  %v3205_v41 = vld [vmem:[%s5460_s0 + $0x140] sm:$0xff] }
  0x26   : > { %v363_v29 = vmax.f32 %v347_v18, 0.0  ;;  %v3220_v35 = vld [vmem:[%s5460_s0 + $0x338] sm:$0xff]  ;;  %222 = vst [vmem:[#allocation2 + $0xf8] sm:$0xff] %v4610_v21  ;;  %v364_v38 = vmax.f32 %v348_v24, 0.0  ;;  %v351_v39 = vadd.f32 %v3219_v34, %v3203_v27  ;;  %v3206_v42 = vld [vmem:[%s5460_s0 + $0x148] sm:$0xff]  ;;  %v3221_v43 = vld [vmem:[%s5460_s0 + $0x340] sm:$0xff] }
  0x27   : > { %v4634_v36 = vpack.c.bf16 %v362_v23, %v361_v22  ;;  %v352_v40 = vadd.f32 %v3220_v35, %v3204_v33  ;;  %223 = vst [vmem:[#allocation2 + $0x100] sm:$0xff] %v4621_v28  ;;  %v365_v45 = vmax.f32 %v349_v31, 0.0  ;;  %v366_v46 = vmax.f32 %v350_v32, 0.0  ;;  %v3222_v47 = vld [vmem:[%s5460_s0 + $0x348] sm:$0xff]  ;;  %v3207_v49 = vld [vmem:[%s5460_s0 + $0x150] sm:$0xff]  ;;  %v3208_v50 = vld [vmem:[%s5460_s0 + $0x158] sm:$0xff] }
  0x28   : > { %v353_v48 = vadd.f32 %v3221_v43, %v3205_v41  ;;  %v4655_v51 = vpack.c.bf16 %v364_v38, %v363_v29  ;;  %v367_v52 = vmax.f32 %v351_v39, 0.0  ;;  %v354_v54 = vadd.f32 %v3222_v47, %v3206_v42  ;;  %v3223_v55 = vld [vmem:[%s5460_s0 + $0x350] sm:$0xff]  ;;  %v3224_v56 = vld [vmem:[%s5460_s0 + $0x358] sm:$0xff]  ;;  %v3209_v58 = vld [vmem:[%s5460_s0 + $0x160] sm:$0xff]  ;;  %492 = vst [vmem:[#allocation3 + $0xd8] sm:$0xff] %v4565_v57 }
  0x29   : > { %v368_v53 = vmax.f32 %v352_v40, 0.0  ;;  %v4666_v59 = vpack.c.bf16 %v366_v46, %v365_v45  ;;  %v355_v61 = vadd.f32 %v3223_v55, %v3207_v49  ;;  %v356_v62 = vadd.f32 %v3224_v56, %v3208_v50  ;;  %v3210_v63 = vld [vmem:[%s5460_s0 + $0x168] sm:$0xff]  ;;  %v3225_v1 = vld [vmem:[%s5460_s0 + $0x360] sm:$0xff]  ;;  %v3211_v9 = vld [vmem:[%s5460_s0 + $0x170] sm:$0xff]  ;;  %493 = vst [vmem:[#allocation3 + $0x120] sm:$0xff] %v4576_v0 }
  0x2a   : > { %v369_v60 = vmax.f32 %v353_v48, 0.0  ;;  %v3226_v2 = vld [vmem:[%s5460_s0 + $0x368] sm:$0xff]  ;;  %v370_v4 = vmax.f32 %v354_v54, 0.0  ;;  %v357_v5 = vadd.f32 %v3225_v1, %v3209_v58  ;;  %v3212_v10 = vld [vmem:[%s5460_s0 + $0x178] sm:$0xff]  ;;  %v3227_v11 = vld [vmem:[%s5460_s0 + $0x370] sm:$0xff]  ;;  %494 = vst [vmem:[#allocation3 + $0x168] sm:$0xff] %v4588_v8 }
  0x2b   : > { %v4678_v3 = vpack.c.bf16 %v368_v53, %v367_v52  ;;  %v358_v6 = vadd.f32 %v3226_v2, %v3210_v63  ;;  %v371_v12 = vmax.f32 %v355_v61, 0.0  ;;  %v372_v13 = vmax.f32 %v356_v62, 0.0  ;;  %v3228_v14 = vld [vmem:[%s5460_s0 + $0x378] sm:$0xff]  ;;  %v3165_v25 = vld [vmem:[%s5460_s0 + $0x80] sm:$0xff]  ;;  %v3166_v26 = vld [vmem:[%s5460_s0 + $0x88] sm:$0xff]  ;;  %495 = vst [vmem:[#allocation3 + $0x1b0] sm:$0xff] %v4610_v21 }
  0x2c   : > { %v359_v15 = vadd.f32 %v3227_v11, %v3211_v9  ;;  %v4692_v16 = vpack.c.bf16 %v370_v4, %v369_v60  ;;  %v373_v17 = vmax.f32 %v357_v5, 0.0  ;;  %v360_v19 = vadd.f32 %v3228_v14, %v3212_v10  ;;  %v3181_v27 = vld [vmem:[%s5460_s0 + $0x280] sm:$0xff]  ;;  %v3182_v29 = vld [vmem:[%s5460_s0 + $0x288] sm:$0xff]  ;;  %v3167_v32 = vld [vmem:[%s5460_s0 + $0x90] sm:$0xff]  ;;  %496 = vst [vmem:[#allocation3 + $0x1f8] sm:$0xff] %v4621_v28 }
  0x2d   : > { %v374_v18 = vmax.f32 %v358_v6, 0.0  ;;  %v4694_v20 = vpack.c.bf16 %v372_v13, %v371_v12  ;;  %v3168_v33 = vld [vmem:[%s5460_s0 + $0x98] sm:$0xff]  ;;  %v3183_v34 = vld [vmem:[%s5460_s0 + $0x290] sm:$0xff]  ;;  %v3169_v38 = vld [vmem:[%s5460_s0 + $0xa0] sm:$0xff]  ;;  %v4742_v43 = vadd.f32 %v3181_v27, %v3165_v25  ;;  %v4744_v45 = vadd.f32 %v3182_v29, %v3166_v26  ;;  %633 = vst [vmem:[#allocation3 + $0x18] sm:$0xff] %v4634_v36 }
  0x2e   : > { %v375_v22 = vmax.f32 %v359_v15, 0.0  ;;  %v376_v24 = vmax.f32 %v360_v19, 0.0  ;;  %v3184_v35 = vld [vmem:[%s5460_s0 + $0x298] sm:$0xff]  ;;  %v3170_v39 = vld [vmem:[%s5460_s0 + $0xa8] sm:$0xff]  ;;  %v3185_v40 = vld [vmem:[%s5460_s0 + $0x2a0] sm:$0xff]  ;;  %v4756_v49 = vadd.f32 %v3183_v34, %v3167_v32  ;;  %634 = vst [vmem:[#allocation3 + $0x60] sm:$0xff] %v4655_v51 }
  0x2f   : > { %v4697_v23 = vpack.c.bf16 %v374_v18, %v373_v17  ;;  %v3186_v41 = vld [vmem:[%s5460_s0 + $0x2a8] sm:$0xff]  ;;  %v3171_v42 = vld [vmem:[%s5460_s0 + $0xb0] sm:$0xff]  ;;  %v3172_v46 = vld [vmem:[%s5460_s0 + $0xb8] sm:$0xff]  ;;  %v4758_v50 = vadd.f32 %v3184_v35, %v3168_v33  ;;  %v4773_v56 = vadd.f32 %v3185_v40, %v3169_v38  ;;  %v276_v12 = vmax.f32 %v4742_v43, 0.0  ;;  %635 = vst [vmem:[#allocation3 + $0xa8] sm:$0xff] %v4666_v59 }
  0x30   : > { %v4711_v31 = vpack.c.bf16 %v376_v24, %v375_v22  ;;  %v3187_v47 = vld [vmem:[%s5460_s0 + $0x2b0] sm:$0xff]  ;;  %v3188_v48 = vld [vmem:[%s5460_s0 + $0x2b8] sm:$0xff]  ;;  %v3173_v52 = vld [vmem:[%s5460_s0 + $0xc0] sm:$0xff]  ;;  %v4775_v58 = vadd.f32 %v3186_v41, %v3170_v39  ;;  %v277_v13 = vmax.f32 %v4744_v45, 0.0  ;;  %v278_v22 = vmax.f32 %v4756_v49, 0.0  ;;  %636 = vst [vmem:[#allocation3 + $0xf0] sm:$0xff] %v4678_v3 }
  0x31   : > { %v3174_v53 = vld [vmem:[%s5460_s0 + $0xc8] sm:$0xff]  ;;  %v3189_v54 = vld [vmem:[%s5460_s0 + $0x2c0] sm:$0xff]  ;;  %v3175_v60 = vld [vmem:[%s5460_s0 + $0xd0] sm:$0xff]  ;;  %v4817_v14 = vadd.f32 %v3187_v47, %v3171_v42  ;;  %v4819_v15 = vadd.f32 %v3188_v48, %v3172_v46  ;;  %v279_v24 = vmax.f32 %v4758_v50, 0.0  ;;  %v280_v29 = vmax.f32 %v4773_v56, 0.0  ;;  %637 = vst [vmem:[#allocation3 + $0x138] sm:$0xff] %v4692_v16 }
  0x32   : > { %v3190_v55 = vld [vmem:[%s5460_s0 + $0x2c8] sm:$0xff]  ;;  %v3176_v61 = vld [vmem:[%s5460_s0 + $0xd8] sm:$0xff]  ;;  %v3191_v62 = vld [vmem:[%s5460_s0 + $0x2d0] sm:$0xff]  ;;  %v281_v32 = vmax.f32 %v4775_v58, 0.0  ;;  %v4845_v33 = vadd.f32 %v3189_v54, %v3173_v52  ;;  %638 = vst [vmem:[#allocation3 + $0x180] sm:$0xff] %v4694_v20 }
  0x33   : > { %v3192_v63 = vld [vmem:[%s5460_s0 + $0x2d8] sm:$0xff]  ;;  %v3177_v1 = vld [vmem:[%s5460_s0 + $0xe0] sm:$0xff]  ;;  %v3178_v2 = vld [vmem:[%s5460_s0 + $0xe8] sm:$0xff]  ;;  %v4847_v34 = vadd.f32 %v3190_v55, %v3174_v53  ;;  %v4859_v40 = vadd.f32 %v3191_v62, %v3175_v60  ;;  %v282_v53 = vmax.f32 %v4817_v14, 0.0  ;;  %v283_v54 = vmax.f32 %v4819_v15, 0.0  ;;  %639 = vst [vmem:[#allocation3 + $0x1c8] sm:$0xff] %v4697_v23 }
  0x34   : > { %v3193_v4 = vld [vmem:[%s5460_s0 + $0x2e0] sm:$0xff]  ;;  %v3194_v5 = vld [vmem:[%s5460_s0 + $0x2e8] sm:$0xff]  ;;  %v3179_v6 = vld [vmem:[%s5460_s0 + $0xf0] sm:$0xff]  ;;  %v4861_v41 = vadd.f32 %v3192_v63, %v3176_v61  ;;  %640 = vst [vmem:[#allocation3 + $0x210] sm:$0xff] %v4711_v31  ;;  %v4958_v49 = vpack.c.bf16 %v281_v32, %v280_v29 }
  0x35   : > { %v3180_v9 = vld [vmem:[%s5460_s0 + $0xf8] sm:$0xff]  ;;  %v3195_v10 = vld [vmem:[%s5460_s0 + $0x2f0] sm:$0xff]  ;;  %v3229_v17 = vld [vmem:[%s5460_s0 + $0x180] sm:$0xff]  ;;  %v4863_v42 = vadd.f32 %v3193_v4, %v3177_v1  ;;  %v4865_v46 = vadd.f32 %v3194_v5, %v3178_v2  ;;  %v286_v15 = vmax.f32 %v4859_v40, 0.0  ;;  %774 = vst [vmem:[#allocation3 + $0x30] sm:$0xff] %v4532_v37  ;;  %v4960_v50 = vpack.c.bf16 %v283_v54, %v282_v53 }
  0x36   : > { %v3196_v11 = vld [vmem:[%s5460_s0 + $0x2f8] sm:$0xff]  ;;  %v3230_v18 = vld [vmem:[%s5460_s0 + $0x188] sm:$0xff]  ;;  %v3245_v19 = vld [vmem:[%s5460_s0 + $0x380] sm:$0xff]  ;;  %v274_v55 = vadd.f32 %v3195_v10, %v3179_v6  ;;  %v285_v10 = vmax.f32 %v4847_v34, 0.0  ;;  %775 = vst [vmem:[#allocation3 + $0x78] sm:$0xff] %v4543_v44 }
  0x37   : > { %v3246_v25 = vld [vmem:[%s5460_s0 + $0x388] sm:$0xff]  ;;  %v3231_v26 = vld [vmem:[%s5460_s0 + $0x190] sm:$0xff]  ;;  %v3232_v27 = vld [vmem:[%s5460_s0 + $0x198] sm:$0xff]  ;;  %v275_v60 = vadd.f32 %v3196_v11, %v3180_v9  ;;  %v4883_v62 = vadd.f32 %v3245_v19, %v3229_v17  ;;  %v284_v9 = vmax.f32 %v4845_v33, 0.0  ;;  %v287_v17 = vmax.f32 %v4861_v41, 0.0  ;;  %776 = vst [vmem:[#allocation3 + $0xc0] sm:$0xff] %v4565_v57 }
  0x38   : > { %v3247_v35 = vld [vmem:[%s5460_s0 + $0x390] sm:$0xff]  ;;  %v3248_v38 = vld [vmem:[%s5460_s0 + $0x398] sm:$0xff]  ;;  %v3233_v39 = vld [vmem:[%s5460_s0 + $0x1a0] sm:$0xff]  ;;  %v431_v63 = vadd.f32 %v3246_v25, %v3230_v18  ;;  %v288_v18 = vmax.f32 %v4863_v42, 0.0  ;;  %v289_v19 = vmax.f32 %v4865_v46, 0.0  ;;  %777 = vst [vmem:[#allocation3 + $0x108] sm:$0xff] %v4576_v0 }
  0x39   : > { %v3234_v47 = vld [vmem:[%s5460_s0 + $0x1a8] sm:$0xff]  ;;  %v3249_v48 = vld [vmem:[%s5460_s0 + $0x3a0] sm:$0xff]  ;;  %v3235_v61 = vld [vmem:[%s5460_s0 + $0x1b0] sm:$0xff]  ;;  %v432_v1 = vadd.f32 %v3247_v35, %v3231_v26  ;;  %v433_v2 = vadd.f32 %v3248_v38, %v3232_v27  ;;  %v290_v26 = vmax.f32 %v274_v55, 0.0  ;;  %v291_v27 = vmax.f32 %v275_v60, 0.0  ;;  %778 = vst [vmem:[#allocation3 + $0x150] sm:$0xff] %v4588_v8 }
  0x3a   : > { %v3250_v52 = vld [vmem:[%s5460_s0 + $0x3a8] sm:$0xff]  ;;  %v3236_v4 = vld [vmem:[%s5460_s0 + $0x1b8] sm:$0xff]  ;;  %v3251_v5 = vld [vmem:[%s5460_s0 + $0x3b0] sm:$0xff]  ;;  %v434_v11 = vadd.f32 %v3249_v48, %v3233_v39  ;;  %v446_v40 = vmax.f32 %v4883_v62, 0.0  ;;  %v447_v41 = vmax.f32 %v431_v63, 0.0  ;;  %v4938_v62 = vpack.c.bf16 %v279_v24, %v278_v22  ;;  %779 = vst [vmem:[#allocation3 + $0x198] sm:$0xff] %v4610_v21 }
  0x3b   : > { %v3252_v6 = vld [vmem:[%s5460_s0 + $0x3b8] sm:$0xff]  ;;  %v435_v14 = vadd.f32 %v3250_v52, %v3234_v47  ;;  %v3237_v25 = vld [vmem:[%s5460_s0 + $0x1c0] sm:$0xff]  ;;  %v436_v33 = vadd.f32 %v3251_v5, %v3235_v61  ;;  %v3238_v35 = vld [vmem:[%s5460_s0 + $0x1c8] sm:$0xff]  ;;  %v448_v42 = vmax.f32 %v432_v1, 0.0  ;;  %v449_v46 = vmax.f32 %v433_v2, 0.0  ;;  %780 = vst [vmem:[#allocation3 + $0x1e0] sm:$0xff] %v4621_v28 }
  0x3c   : > { %v437_v34 = vadd.f32 %v3252_v6, %v3236_v4  ;;  %v3253_v38 = vld [vmem:[%s5460_s0 + $0x3c0] sm:$0xff]  ;;  %v3254_v39 = vld [vmem:[%s5460_s0 + $0x3c8] sm:$0xff]  ;;  %v450_v47 = vmax.f32 %v434_v11, 0.0  ;;  %v3239_v52 = vld [vmem:[%s5460_s0 + $0x1d0] sm:$0xff]  ;;  %v4932_v61 = vpack.c.bf16 %v277_v13, %v276_v12  ;;  %v4972_v58 = vpack.c.bf16 %v285_v10, %v284_v9  ;;  %506 = vst [vmem:[#allocation3 + $0x50] sm:$0xff] %v4938_v62 }
  0x3d   : > { %v451_v48 = vmax.f32 %v435_v14, 0.0  ;;  %v3240_v55 = vld [vmem:[%s5460_s0 + $0x1d8] sm:$0xff]  ;;  %v3255_v60 = vld [vmem:[%s5460_s0 + $0x3d0] sm:$0xff]  ;;  %v4940_v63 = vadd.f32 %v3253_v38, %v3237_v25  ;;  %v4942_v1 = vadd.f32 %v3254_v39, %v3238_v35  ;;  %v3241_v43 = vld [vmem:[%s5460_s0 + $0x1e0] sm:$0xff]  ;;  %v452_v12 = vmax.f32 %v436_v33, 0.0  ;;  %507 = vst [vmem:[#allocation3 + $0x98] sm:$0xff] %v4958_v49 }
  0x3e   : > { %v3256_v2 = vld [vmem:[%s5460_s0 + $0x3d8] sm:$0xff]  ;;  %v3242_v45 = vld [vmem:[%s5460_s0 + $0x1e8] sm:$0xff]  ;;  %v453_v13 = vmax.f32 %v437_v34, 0.0  ;;  %v3257_v22 = vld [vmem:[%s5460_s0 + $0x3e0] sm:$0xff]  ;;  %v4974_v29 = vpack.c.bf16 %v287_v17, %v286_v15  ;;  %v4976_v32 = vpack.c.bf16 %v289_v19, %v288_v18  ;;  %v4978_v53 = vpack.c.bf16 %v291_v27, %v290_v26  ;;  %505 = vst [vmem:[#allocation3 + $0x8] sm:$0xff] %v4932_v61 }
  0x3f   : > { %v3258_v24 = vld [vmem:[%s5460_s0 + $0x3e8] sm:$0xff]  ;;  %v3243_v56 = vld [vmem:[%s5460_s0 + $0x1f0] sm:$0xff]  ;;  %v3244_v54 = vld [vmem:[%s5460_s0 + $0x1f8] sm:$0xff]  ;;  %v4990_v6 = vpack.c.bf16 %v447_v41, %v446_v40  ;;  %v4992_v9 = vpack.c.bf16 %v449_v46, %v448_v42  ;;  %v4994_v10 = vpack.c.bf16 %v451_v48, %v450_v47  ;;  %v440_v11 = vadd.f32 %v3255_v60, %v3239_v52  ;;  %508 = vst [vmem:[#allocation3 + $0xe0] sm:$0xff] %v4960_v50 }
  0x40   : > { %v3259_v4 = vld [vmem:[%s5460_s0 + $0x3f0] sm:$0xff]  ;;  %v3260_v5 = vld [vmem:[%s5460_s0 + $0x3f8] sm:$0xff]  ;;  %v454_v14 = vmax.f32 %v4940_v63, 0.0  ;;  %v455_v15 = vmax.f32 %v4942_v1, 0.0  ;;  %v441_v17 = vadd.f32 %v3256_v2, %v3240_v55  ;;  %v442_v18 = vadd.f32 %v3257_v22, %v3241_v43  ;;  %vm5043_vm2 = vmor %vm522_vm0, %vm523_vm1  ;;  %509 = vst [vmem:[#allocation3 + $0x128] sm:$0xff] %v4972_v58 }
  0x41   : > { %v4999_v19 = vpack.c.bf16 %v453_v13, %v452_v12  ;;  %v443_v25 = vadd.f32 %v3258_v24, %v3242_v45  ;;  %v444_v26 = vadd.f32 %v3259_v4, %v3243_v56  ;;  %v445_v27 = vadd.f32 %v3260_v5, %v3244_v54  ;;  %510 = vst [vmem:[#allocation3 + $0x170] sm:$0xff] %v4974_v29 }
  0x42   : > { %v526_v33 = vshrl.u32 %v4521_v30, 16  ;;  %v529_v34 = vshll.u32 %v4521_v30, 16  ;;  %v535_v35 = vshll.u32 %v4532_v37, 16  ;;  %v539_v38 = vshrl.u32 %v4532_v37, 16  ;;  %511 = vst [vmem:[#allocation3 + $0x1b8] sm:$0xff] %v4976_v32 }
  0x43   : > { %v456_v7 = vmax.f32 %v440_v11, 0.0  ;;  %v545_v39 = vshll.u32 %v4543_v44, 16  ;;  %v549_v40 = vshrl.u32 %v4543_v44, 16  ;;  %v555_v41 = vshll.u32 %v4565_v57, 16  ;;  %512 = vst [vmem:[#allocation3 + $0x200] sm:$0xff] %v4978_v53 }
  0x44   : > { %v457_v42 = vmax.f32 %v441_v17, 0.0  ;;  %v559_v46 = vshrl.u32 %v4565_v57, 16  ;;  %v565_v47 = vshll.u32 %v4576_v0, 16  ;;  %v569_v48 = vshrl.u32 %v4576_v0, 16  ;;  %649 = vst [vmem:[#allocation3 + $0x20] sm:$0xff] %v4990_v6 }
  0x45   : > { %v458_v52 = vmax.f32 %v442_v18, 0.0  ;;  %v459_v30 = vmax.f32 %v443_v25, 0.0  ;;  %v460_v55 = vmax.f32 %v444_v26, 0.0  ;;  %v461_v60 = vmax.f32 %v445_v27, 0.0  ;;  %650 = vst [vmem:[#allocation3 + $0x68] sm:$0xff] %v4992_v9 }
  0x46   : > { %v528_v63 = vrot.slane %v526_v33, 4  ;;  %v531_v37 = vrot.slane %v529_v34, 5  ;;  %v5011_v1 = vrot.slane %v535_v35, 5  ;;  %v541_v2 = vrot.slane %v539_v38, 4  ;;  %651 = vst [vmem:[#allocation3 + $0xb0] sm:$0xff] %v4994_v10 }
  0x47   : > { %v5013_v43 = vrot.slane %v545_v39, 5  ;;  %v551_v44 = vrot.slane %v549_v40, 4  ;;  %v5015_v45 = vrot.slane %v555_v41, 5  ;;  %v575_v57 = vshll.u32 %v4588_v8, 16  ;;  %v521_v39 = vld [vmem:[#allocation2 + $0x80] sm:$0x11] }
  0x48   : > { %v561_v12 = vrot.slane %v559_v46, 4  ;;  %v5018_v13 = vrot.slane %v565_v47, 5  ;;  %v571_v0 = vrot.slane %v569_v48, 4  ;;  %v579_v22 = vshrl.u32 %v4588_v8, 16  ;;  %652 = vst [vmem:[#allocation3 + $0xf8] sm:$0xff] %v4999_v19 }
  0x49   : > { %v5021_v24 = vpack.c.bf16 %v455_v15, %v454_v14  ;;  %v585_v56 = vshll.u32 %v4610_v21, 16  ;;  %v589_v54 = vshrl.u32 %v4610_v21, 16  ;;  %v5025_v4 = vpack.c.bf16 %v457_v42, %v456_v7  ;;  %790 = vst [vmem:[#allocation3 + $0x38] sm:$0xff] %v4938_v62 }
  0x4a   : > { %v5027_v5 = vpack.c.bf16 %v459_v30, %v458_v52  ;;  %v5029_v11 = vpack.c.bf16 %v461_v60, %v460_v55  ;;  %v532_v17 = vor.u32 %v531_v37, %v528_v63  ;;  %v542_v18 = vor.u32 %v541_v2, %v5011_v1  ;;  %791 = vst [vmem:[#allocation3 + $0x80] sm:$0xff] %v4958_v49 }
  0x4b   : > { %v552_v25 = vor.u32 %v551_v44, %v5013_v43  ;;  %v562_v8 = vor.u32 %v561_v12, %v5015_v45  ;;  %v572_v14 = vor.u32 %v571_v0, %v5018_v13  ;;  %v5035_v15 = vrot.slane %v575_v57, 5  ;;  %653 = vst [vmem:[#allocation3 + $0x140] sm:$0xff] %v5021_v24 }
  0x4c   : > { %v581_v21 = vrot.slane %v579_v22, 4  ;;  %v5037_v26 = vrot.slane %v585_v56, 5  ;;  %v591_v27 = vrot.slane %v589_v54, 4  ;;  %v595_v33 = vshll.u32 %v4621_v28, 16  ;;  %654 = vst [vmem:[#allocation3 + $0x188] sm:$0xff] %v5025_v4 }
  0x4d   : > { %v599_v34 = vshrl.u32 %v4621_v28, 16  ;;  %v533_v35 = vrot.slane %v532_v17, 4  ;;  %v543_v38 = vrot.slane %v542_v18, 4  ;;  %v553_v7 = vrot.slane %v552_v25, 4  ;;  %655 = vst [vmem:[#allocation3 + $0x1d0] sm:$0xff] %v5027_v5 }
  0x4e   : > { %v563_v41 = vrot.slane %v562_v8, 4  ;;  %v573_v42 = vrot.slane %v572_v14, 4  ;;  %v582_v46 = vor.u32 %v581_v21, %v5035_v15  ;;  %v592_v47 = vor.u32 %v591_v27, %v5037_v26  ;;  %656 = vst [vmem:[#allocation3 + $0x218] sm:$0xff] %v5029_v11 }
  0x4f   : > { %v597_v48 = vrot.slane %v595_v33, 5  ;;  %v601_v28 = vrot.slane %v599_v34, 4  ;;  %v605_v52 = vshll.u32 %v521_v39, 16  ;;  %v667_v30 = vshrl.u32 %v4634_v36, 16  ;;  %792 = vst [vmem:[#allocation3 + $0xc8] sm:$0xff] %v4960_v50 }
  0x50   : > { %v538_v55 = vsel %vm5043_vm2, %v533_v35, %v5011_v1  ;;  %v548_v60 = vsel %vm5043_vm2, %v543_v38, %v5013_v43  ;;  %v558_v61 = vsel %vm5043_vm2, %v553_v7, %v5015_v45  ;;  %v568_v63 = vsel %vm5043_vm2, %v563_v41, %v5018_v13  ;;  %793 = vst [vmem:[#allocation3 + $0x110] sm:$0xff] %v4972_v58 }
  0x51   : > { %v578_v37 = vsel %vm5043_vm2, %v573_v42, %v5035_v15  ;;  %v583_v2 = vrot.slane %v582_v46, 4  ;;  %v670_v1 = vshll.u32 %v4634_v36, 16  ;;  %v593_v43 = vrot.slane %v592_v47, 4  ;;  %617 = vst [vmem:[#allocation3 + $0x10] sm:$0xff] %v538_v55 }
  0x52   : > { %v602_v44 = vor.u32 %v601_v28, %v597_v48  ;;  %v676_v57 = vshll.u32 %v4655_v51, 16  ;;  %v680_v45 = vshrl.u32 %v4655_v51, 16  ;;  %v607_v12 = vrot.slane %v605_v52, 5  ;;  %618 = vst [vmem:[#allocation3 + $0x58] sm:$0xff] %v548_v60 }
  0x53   : > { %v669_v0 = vrot.slane %v667_v30, 4  ;;  %v686_v13 = vshll.u32 %v4666_v59, 16  ;;  %v690_v22 = vshrl.u32 %v4666_v59, 16  ;;  %v696_v36 = vshll.u32 %v4678_v3, 16  ;;  %619 = vst [vmem:[#allocation3 + $0xa0] sm:$0xff] %v558_v61 }
  0x54   : > { %v700_v56 = vshrl.u32 %v4678_v3, 16  ;;  %v706_v54 = vshll.u32 %v4692_v16, 16  ;;  %v710_v17 = vshrl.u32 %v4692_v16, 16  ;;  %v588_v51 = vsel %vm5043_vm2, %v583_v2, %v5037_v26  ;;  %620 = vst [vmem:[#allocation3 + $0xe8] sm:$0xff] %v568_v63  ;;  %v665_v63 = vld [vmem:[#allocation2 + $0x68] sm:$0x11] }
  0x55   : > { %v672_v18 = vrot.slane %v670_v1, 5  ;;  %v716_v25 = vshll.u32 %v4694_v20, 16  ;;  %v720_v59 = vshrl.u32 %v4694_v20, 16  ;;  %v598_v8 = vsel %vm5043_vm2, %v593_v43, %v597_v48  ;;  %621 = vst [vmem:[#allocation3 + $0x130] sm:$0xff] %v578_v37  ;;  %v798_v43 = vld [vmem:[#allocation2 + $0xd0] sm:$0xff] }
  0x56   : > { %v603_v3 = vrot.slane %v602_v44, 4  ;;  %v5089_v14 = vrot.slane %v676_v57, 5  ;;  %v682_v15 = vrot.slane %v680_v45, 4  ;;  %v5091_v16 = vrot.slane %v686_v13, 5  ;;  %622 = vst [vmem:[#allocation3 + $0x178] sm:$0xff] %v588_v51  ;;  %v799_v45 = vld [vmem:[#allocation2 + $0x10] sm:$0xff] }
  0x57   : > { %v692_v21 = vrot.slane %v690_v22, 4  ;;  %v726_v27 = vshll.u32 %v4697_v23, 16  ;;  %v730_v26 = vshrl.u32 %v4697_v23, 16  ;;  %v5095_v33 = vrot.slane %v696_v36, 5  ;;  %623 = vst [vmem:[#allocation3 + $0x1c0] sm:$0xff] %v598_v8  ;;  %v800_v13 = vld [vmem:[#allocation2 + $0x48] sm:$0xff] }
  0x58   : > { %v702_v20 = vrot.slane %v700_v56, 4  ;;  %v5097_v34 = vrot.slane %v706_v54, 5  ;;  %v712_v35 = vrot.slane %v710_v17, 4  ;;  %v5099_v38 = vrot.slane %v716_v25, 5  ;;  %v801_v17 = vld [vmem:[#allocation2 + $0x120] sm:$0xff]  ;;  %v802_v25 = vld [vmem:[#allocation2 + $0x38] sm:$0xff] }
  0x59   : > { %v722_v7 = vrot.slane %v720_v59, 4  ;;  %v736_v39 = vshll.u32 %v4711_v31, 16  ;;  %v740_v41 = vshrl.u32 %v4711_v31, 16  ;;  %v608_v42 = vsel %vm5043_vm2, %v603_v3, %v607_v12  ;;  %794 = vst [vmem:[#allocation3 + $0x158] sm:$0xff] %v4974_v29 }
  0x5a   : > { %v673_v23 = vor.u32 %v672_v18, %v669_v0  ;;  %v683_v46 = vor.u32 %v682_v15, %v5089_v14  ;;  %v693_v47 = vor.u32 %v692_v21, %v5091_v16  ;;  %v5107_v48 = vrot.slane %v726_v27, 5  ;;  %624 = vst [vmem:[#allocation3 + $0x208] sm:$0xff] %v608_v42 }
  0x5b   : > { %v732_v28 = vrot.slane %v730_v26, 4  ;;  %v703_v52 = vor.u32 %v702_v20, %v5095_v33  ;;  %v713_v30 = vor.u32 %v712_v35, %v5097_v34  ;;  %v723_v31 = vor.u32 %v722_v7, %v5099_v38  ;;  %v804_v26 = vld [vmem:[#allocation2 + $0x100] sm:$0xff]  ;;  %795 = vst [vmem:[#allocation3 + $0x1a0] sm:$0xff] %v4976_v32 }
  0x5c   : > { %v5112_v55 = vrot.slane %v736_v39, 5  ;;  %v742_v60 = vrot.slane %v740_v41, 4  ;;  %v674_v61 = vrot.slane %v673_v23, 4  ;;  %v684_v37 = vrot.slane %v683_v46, 4  ;;  %796 = vst [vmem:[#allocation3 + $0x1e8] sm:$0xff] %v4978_v53 }
  0x5d   : > { %v694_v2 = vrot.slane %v693_v47, 4  ;;  %v733_v1 = vor.u32 %v732_v28, %v5107_v48  ;;  %v704_v44 = vrot.slane %v703_v52, 4  ;;  %v714_v57 = vrot.slane %v713_v30, 4  ;;  %v4387_v28 = vld [vmem:[#allocation2 + $0x80] sm:$0xff] }
  0x5e   : > { %v724_v12 = vrot.slane %v723_v31, 4  ;;  %v743_v0 = vor.u32 %v742_v60, %v5112_v55  ;;  %v746_v6 = vshll.u32 %v665_v63, 16  ;;  %v679_v9 = vsel %vm5043_vm2, %v674_v61, %v5089_v14  ;;  %v803_v14 = vld [vmem:[#allocation2 + $0xf8] sm:$0xff]  ;;  %797 = vst [vmem:[#allocation3 + $0x230] sm:$0xff] %v4387_v28 }
  0x5f   : > { %v808_v22 = vshrl.u32 %v798_v43, 16  ;;  %v811_v36 = vshll.u32 %v798_v43, 16  ;;  %v689_v10 = vsel %vm5043_vm2, %v684_v37, %v5091_v16  ;;  %v699_v19 = vsel %vm5043_vm2, %v694_v2, %v5095_v33  ;;  %758 = vst [vmem:[#allocation3 + $0x28] sm:$0xff] %v679_v9 }
  0x60   : > { %v734_v56 = vrot.slane %v733_v1, 4  ;;  %v817_v54 = vshll.u32 %v799_v45, 16  ;;  %v709_v24 = vsel %vm5043_vm2, %v704_v44, %v5097_v34  ;;  %v719_v4 = vsel %vm5043_vm2, %v714_v57, %v5099_v38  ;;  %759 = vst [vmem:[#allocation3 + $0x70] sm:$0xff] %v689_v10 }
  0x61   : > { %v821_v51 = vshrl.u32 %v799_v45, 16  ;;  %v827_v18 = vshll.u32 %v800_v13, 16  ;;  %v729_v59 = vsel %vm5043_vm2, %v724_v12, %v5107_v48  ;;  %v744_v8 = vrot.slane %v743_v0, 4  ;;  %760 = vst [vmem:[#allocation3 + $0xb8] sm:$0xff] %v699_v19 }
  0x62   : > { %v748_v3 = vrot.slane %v746_v6, 5  ;;  %v831_v5 = vshrl.u32 %v800_v13, 16  ;;  %v810_v15 = vrot.slane %v808_v22, 4  ;;  %v813_v16 = vrot.slane %v811_v36, 5  ;;  %761 = vst [vmem:[#allocation3 + $0x100] sm:$0xff] %v709_v24 }
  0x63   : > { %v837_v21 = vshll.u32 %v801_v17, 16  ;;  %v841_v27 = vshrl.u32 %v801_v17, 16  ;;  %v739_v33 = vsel %vm5043_vm2, %v734_v56, %v5112_v55  ;;  %v819_v11 = vrot.slane %v817_v54, 5  ;;  %762 = vst [vmem:[#allocation3 + $0x148] sm:$0xff] %v719_v4  ;;  %v806_v6 = vld [vmem:[#allocation2 + $0x108] sm:$0x11] }
  0x64   : > { %v847_v20 = vshll.u32 %v802_v25, 16  ;;  %v851_v34 = vshrl.u32 %v802_v25, 16  ;;  %v823_v35 = vrot.slane %v821_v51, 4  ;;  %v829_v38 = vrot.slane %v827_v18, 5  ;;  %763 = vst [vmem:[#allocation3 + $0x190] sm:$0xff] %v729_v59 }
  0x65   : > { %v857_v7 = vshll.u32 %v803_v14, 16  ;;  %v861_v39 = vshrl.u32 %v803_v14, 16  ;;  %v749_v41 = vsel %vm5043_vm2, %v744_v8, %v748_v3  ;;  %v833_v42 = vrot.slane %v831_v5, 4  ;;  %764 = vst [vmem:[#allocation3 + $0x1d8] sm:$0xff] %v739_v33 }
  0x66   : > { %v867_v23 = vshll.u32 %v804_v26, 16  ;;  %v871_v46 = vshrl.u32 %v804_v26, 16  ;;  %v839_v47 = vrot.slane %v837_v21, 5  ;;  %v843_v48 = vrot.slane %v841_v27, 4  ;;  %765 = vst [vmem:[#allocation3 + $0x220] sm:$0xff] %v749_v41 }
  0x67   : > { %v877_v52 = vshll.u32 %v4387_v28, 16  ;;  %v881_v30 = vshrl.u32 %v4387_v28, 16  ;;  %v814_v31 = vor.u32 %v813_v16, %v810_v15  ;;  %v849_v55 = vrot.slane %v847_v20, 5 }
  0x68   : > { %v853_v60 = vrot.slane %v851_v34, 4  ;;  %v824_v61 = vor.u32 %v823_v35, %v819_v11  ;;  %v859_v63 = vrot.slane %v857_v7, 5  ;;  %v863_v37 = vrot.slane %v861_v39, 4 }
  0x69   : > { %v834_v2 = vor.u32 %v833_v42, %v829_v38  ;;  %v869_v1 = vrot.slane %v867_v23, 5  ;;  %v873_v43 = vrot.slane %v871_v46, 4  ;;  %v844_v44 = vor.u32 %v843_v48, %v839_v47 }
  0x6a   : > { %v879_v57 = vrot.slane %v877_v52, 5  ;;  %v883_v45 = vrot.slane %v881_v30, 4  ;;  %v815_v12 = vrot.slane %v814_v31, 4  ;;  %v854_v0 = vor.u32 %v853_v60, %v849_v55 }
  0x6b   : > { %v825_v13 = vrot.slane %v824_v61, 4  ;;  %v864_v9 = vor.u32 %v863_v37, %v859_v63  ;;  %v835_v22 = vrot.slane %v834_v2, 4  ;;  %v874_v36 = vor.u32 %v873_v43, %v869_v1 }
  0x6c   : > { %v845_v10 = vrot.slane %v844_v44, 4  ;;  %v884_v62 = vor.u32 %v883_v45, %v879_v57  ;;  %v887_v19 = vshll.u32 %v806_v6, 16  ;;  %v820_v49 = vsel %vm5043_vm2, %v815_v12, %v819_v11 }
  0x6d   : > { %v855_v56 = vrot.slane %v854_v0, 4  ;;  %v830_v50 = vsel %vm5043_vm2, %v825_v13, %v829_v38  ;;  %v865_v54 = vrot.slane %v864_v9, 4  ;;  %v840_v58 = vsel %vm5043_vm2, %v835_v22, %v839_v47  ;;  %899 = vst [vmem:[#allocation3 + $0x40] sm:$0xff] %v820_v49 }
  0x6e   : > { %v875_v29 = vrot.slane %v874_v36, 4  ;;  %v850_v17 = vsel %vm5043_vm2, %v845_v10, %v849_v55  ;;  %v885_v32 = vrot.slane %v884_v62, 4  ;;  %v889_v24 = vrot.slane %v887_v19, 5  ;;  %900 = vst [vmem:[#allocation3 + $0x88] sm:$0xff] %v830_v50 }
  0x6f   : > { %v860_v4 = vsel %vm5043_vm2, %v855_v56, %v859_v63  ;;  %901 = vst [vmem:[#allocation3 + $0xd0] sm:$0xff] %v840_v58  ;;  %v870_v53 = vsel %vm5043_vm2, %v865_v54, %v869_v1 }
  0x70   : > { %902 = vst [vmem:[#allocation3 + $0x118] sm:$0xff] %v850_v17  ;;  %v880_v51 = vsel %vm5043_vm2, %v875_v29, %v879_v57  ;;  %v890_v18 = vsel %vm5043_vm2, %v885_v32, %v889_v24 }
  0x71   : > { %903 = vst [vmem:[#allocation3 + $0x160] sm:$0xff] %v860_v4 }
  0x72   : > { %904 = vst [vmem:[#allocation3 + $0x1a8] sm:$0xff] %v870_v53 }
  0x73   : > { %905 = vst [vmem:[#allocation3 + $0x1f0] sm:$0xff] %v880_v51 }
  0x74   : > { %906 = vst [vmem:[#allocation3 + $0x238] sm:$0xff] %v890_v18 }
  0x75 PF: > { %v4208_v25 = vld [vmem:[%s4459_s24 + $0x38] sm:$0xff]  ;;  %v4207_v8 = vld [vmem:[%s4459_s24 + $0x30] sm:$0xff]  ;;  %v4206_v40 = vld [vmem:[%s4459_s24 + $0x28] sm:$0xff] }
  0x76   : > { %v4216_v59 = vld [vmem:[%s4459_s24 + $0x78] sm:$0xff]  ;;  %4345 = vmatpush.bf16.msra.mxu2 %v4208_v25  ;;  %v4215_v3 = vld [vmem:[%s4459_s24 + $0x70] sm:$0xff]  ;;  %2491 = vmatpush.bf16.msra.mxu0 %v4208_v25  ;;  %v4214_v5 = vld [vmem:[%s4459_s24 + $0x68] sm:$0xff] }
  0x77   : > { %4353 = vmatpush.bf16.msra.mxu3 %v4216_v59  ;;  %2520 = vmatpush.bf16.msra.mxu1 %v4216_v59  ;;  %v4205_v14 = vld [vmem:[%s4459_s24 + $0x20] sm:$0xff]  ;;  %v4204_v16 = vld [vmem:[%s4459_s24 + $0x18] sm:$0xff]  ;;  %v4203_v27 = vld [vmem:[%s4459_s24 + $0x10] sm:$0xff] }
  0x78   : > { %v4213_v15 = vld [vmem:[%s4459_s24 + $0x60] sm:$0xff]  ;;  %v4212_v21 = vld [vmem:[%s4459_s24 + $0x58] sm:$0xff]  ;;  %v4211_v26 = vld [vmem:[%s4459_s24 + $0x50] sm:$0xff] }
  0x79   : > { %v4202_v33 = vld [vmem:[%s4459_s24 + $0x8] sm:$0xff]  ;;  %v4201_v20 = vld [vmem:[%s4459_s24] sm:$0xff]  ;;  %v4224_v47 = vld [vmem:[%s4459_s24 + $0xb8] sm:$0xff] }
  0x7a   : > { %4346 = vmatpush.bf16.msra.mxu2 %v4207_v8  ;;  %2492 = vmatpush.bf16.msra.mxu0 %v4207_v8  ;;  %v4210_v11 = vld [vmem:[%s4459_s24 + $0x48] sm:$0xff]  ;;  %v4209_v34 = vld [vmem:[%s4459_s24 + $0x40] sm:$0xff]  ;;  %v4232_v48 = vld [vmem:[%s4459_s24 + $0xf8] sm:$0xff] }
  0x7b   : > { %4354 = vmatpush.bf16.msra.mxu3 %v4215_v3  ;;  %2521 = vmatpush.bf16.msra.mxu1 %v4215_v3  ;;  %v3407_v35 = vld [vmem:[#allocation3 + $0x120] sm:$0xf]  ;;  %v4174_v38 = vld [vmem:[#allocation3 + $0x164] sm:$0xf0]  ;;  %v4165_v7 = vld [vmem:[#allocation3 + $0x124] sm:$0xf] }
  0x7c   : > { %v3409_v39 = vld [vmem:[#allocation3 + $0x168] sm:$0xf0]  ;;  %v3263_v41 = vld [vmem:[#allocation3] sm:$0xf]  ;;  %v4138_v42 = vld [vmem:[#allocation3 + $0x44] sm:$0xf0]  ;;  %v3408_v28 = vor.u32 %v4174_v38, %v3407_v35 }
  0x7d   : > { %v4129_v23 = vld [vmem:[#allocation3 + $0x4] sm:$0xf]  ;;  %v3265_v46 = vld [vmem:[#allocation3 + $0x48] sm:$0xf0]  ;;  %v3412_v52 = vor.u32 %v4165_v7, %v3409_v39  ;;  %v3264_v30 = vor.u32 %v4138_v42, %v3263_v41  ;;  %v4240_v55 = vld [vmem:[%s4459_s24 + $0x138] sm:$0xff] }
  0x7e   : > { %4347 = vmatpush.bf16.msra.mxu2 %v4206_v40  ;;  %2493 = vmatpush.bf16.msra.mxu0 %v4206_v40  ;;  %v3268_v31 = vor.u32 %v4129_v23, %v3265_v46  ;;  %v4248_v60 = vld [vmem:[%s4459_s24 + $0x178] sm:$0xff]  ;;  %v4223_v61 = vld [vmem:[%s4459_s24 + $0xb0] sm:$0xff]  ;;  %v4222_v1 = vld [vmem:[%s4459_s24 + $0xa8] sm:$0xff] }
  0x7f   : > { %4355 = vmatpush.bf16.msra.mxu3 %v4214_v5  ;;  %2522 = vmatpush.bf16.msra.mxu1 %v4214_v5  ;;  %v4231_v63 = vld [vmem:[%s4459_s24 + $0xf0] sm:$0xff]  ;;  %v4230_v43 = vld [vmem:[%s4459_s24 + $0xe8] sm:$0xff]  ;;  %v4221_v45 = vld [vmem:[%s4459_s24 + $0xa0] sm:$0xff] }
  0x80   : > { %v4239_v37 = vld [vmem:[%s4459_s24 + $0x130] sm:$0xff]  ;;  %v4238_v44 = vld [vmem:[%s4459_s24 + $0x128] sm:$0xff]  ;;  %v4229_v12 = vld [vmem:[%s4459_s24 + $0xe0] sm:$0xff] }
  0x81   : > { %v4247_v2 = vld [vmem:[%s4459_s24 + $0x170] sm:$0xff]  ;;  %v4246_v57 = vld [vmem:[%s4459_s24 + $0x168] sm:$0xff]  ;;  %v4237_v0 = vld [vmem:[%s4459_s24 + $0x120] sm:$0xff] }
  0x82   : > { %4348 = vmatpush.bf16.msra.mxu2 %v4205_v14  ;;  %2494 = vmatpush.bf16.msra.mxu0 %v4205_v14  ;;  %v3479_v6 = vld [vmem:[#allocation3 + $0x1b0] sm:$0xf]  ;;  %v4192_v13 = vld [vmem:[#allocation3 + $0x1f4] sm:$0xf0]  ;;  %v4183_v9 = vld [vmem:[#allocation3 + $0x1b4] sm:$0xf] }
  0x83   : > { %4356 = vmatpush.bf16.msra.mxu3 %v4213_v15  ;;  %2523 = vmatpush.bf16.msra.mxu1 %v4213_v15  ;;  %v3481_v22 = vld [vmem:[#allocation3 + $0x1f8] sm:$0xf0]  ;;  %v4245_v36 = vld [vmem:[%s4459_s24 + $0x160] sm:$0xff]  ;;  %v3335_v10 = vld [vmem:[#allocation3 + $0x90] sm:$0xf]  ;;  %v3480_v54 = vor.u32 %v4192_v13, %v3479_v6 }
  0x84   : > { %v4156_v62 = vld [vmem:[#allocation3 + $0xd4] sm:$0xf0]  ;;  %v4147_v19 = vld [vmem:[#allocation3 + $0x94] sm:$0xf]  ;;  %v3337_v49 = vld [vmem:[#allocation3 + $0xd8] sm:$0xf0]  ;;  %v3484_v58 = vor.u32 %v4183_v9, %v3481_v22 }
  0x85   : > { %v4220_v56 = vld [vmem:[%s4459_s24 + $0x98] sm:$0xff]  ;;  %v3336_v29 = vor.u32 %v4156_v62, %v3335_v10  ;;  %v3340_v17 = vor.u32 %v4147_v19, %v3337_v49  ;;  %v4219_v4 = vld [vmem:[%s4459_s24 + $0x90] sm:$0xff]  ;;  %v4218_v25 = vld [vmem:[%s4459_s24 + $0x88] sm:$0xff] }
  0x86   : > { %4349 = vmatpush.bf16.msra.mxu2 %v4204_v16  ;;  %2495 = vmatpush.bf16.msra.mxu0 %v4204_v16  ;;  %v4228_v50 = vld [vmem:[%s4459_s24 + $0xd8] sm:$0xff]  ;;  %v4227_v53 = vld [vmem:[%s4459_s24 + $0xd0] sm:$0xff]  ;;  %v4226_v59 = vld [vmem:[%s4459_s24 + $0xc8] sm:$0xff] }
  0x87   : > { %4357 = vmatpush.bf16.msra.mxu3 %v4212_v21  ;;  %2524 = vmatpush.bf16.msra.mxu1 %v4212_v21  ;;  %v4236_v32 = vld [vmem:[%s4459_s24 + $0x118] sm:$0xff]  ;;  %v4235_v51 = vld [vmem:[%s4459_s24 + $0x110] sm:$0xff]  ;;  %v4234_v8 = vld [vmem:[%s4459_s24 + $0x108] sm:$0xff] }
  0x88   : > { %v4244_v24 = vld [vmem:[%s4459_s24 + $0x158] sm:$0xff]  ;;  %v4243_v18 = vld [vmem:[%s4459_s24 + $0x150] sm:$0xff]  ;;  %v4217_v3 = vld [vmem:[%s4459_s24 + $0x80] sm:$0xff] }
  0x89   : > { %v4242_v40 = vld [vmem:[%s4459_s24 + $0x148] sm:$0xff]  ;;  %v4225_v5 = vld [vmem:[%s4459_s24 + $0xc0] sm:$0xff]  ;;  %v4139_v15 = vld [vmem:[#allocation3 + $0x4c] sm:$0xf0] }
  0x8a   : > { %4350 = vmatpush.bf16.msra.mxu2 %v4203_v27  ;;  %2496 = vmatpush.bf16.msra.mxu0 %v4203_v27  ;;  %v3271_v14 = vld [vmem:[#allocation3 + $0x8] sm:$0xf]  ;;  %v4233_v16 = vld [vmem:[%s4459_s24 + $0x100] sm:$0xff]  ;;  %v4130_v21 = vld [vmem:[#allocation3 + $0xc] sm:$0xf] }
  0x8b   : > { %4358 = vmatpush.bf16.msra.mxu3 %v4211_v26  ;;  %2525 = vmatpush.bf16.msra.mxu1 %v4211_v26  ;;  %v4256_v27 = vld [vmem:[%s4459_s24 + $0x1b8] sm:$0xff]  ;;  %v4131_v35 = vld [vmem:[#allocation3 + $0x14] sm:$0xf]  ;;  %v3272_v41 = vor.u32 %v4139_v15, %v3271_v14  ;;  %v3353_v6 = vld [vmem:[#allocation3 + $0xe8] sm:$0xf0] }
  0x8c   : > { %v4264_v26 = vld [vmem:[%s4459_s24 + $0x1f8] sm:$0xff] }
  0x8d   : > { %v3281_v38 = vld [vmem:[#allocation3 + $0x58] sm:$0xf0] }
  0x8e   : > { %4351 = vmatpush.bf16.msra.mxu2 %v4202_v33  ;;  %2497 = vmatpush.bf16.msra.mxu0 %v4202_v33  ;;  %v3273_v33 = vld [vmem:[#allocation3 + $0x50] sm:$0xf0]  ;;  %v4272_v7 = vld [vmem:[%s4459_s24 + $0x238] sm:$0xff]  ;;  %v3284_v46 = vor.u32 %v4131_v35, %v3281_v38 }
  0x8f   : > { %4359 = vmatpush.bf16.msra.mxu3 %v4210_v11  ;;  %2526 = vmatpush.bf16.msra.mxu1 %v4210_v11  ;;  %v4241_v11 = vld [vmem:[%s4459_s24 + $0x140] sm:$0xff]  ;;  %v4280_v39 = vld [vmem:[%s4459_s24 + $0x278] sm:$0xff]  ;;  %v3276_v42 = vor.u32 %v4130_v21, %v3273_v33  ;;  %v4295_v35 = vld [vmem:[%s4459_s24 + $0x2f0] sm:$0xff] }
  0x90   : > { %v4252_v13 = vld [vmem:[%s4459_s24 + $0x198] sm:$0xff] }
  0x91   : > { %v4260_v9 = vld [vmem:[%s4459_s24 + $0x1d8] sm:$0xff] }
  0x92   : > { %4352 = vmatpush.bf16.msra.mxu2 %v4201_v20  ;;  %2498 = vmatpush.bf16.msra.mxu0 %v4201_v20  ;;  %v3279_v20 = vld [vmem:[#allocation3 + $0x10] sm:$0xf]  ;;  %v4268_v22 = vld [vmem:[%s4459_s24 + $0x218] sm:$0xff] }
  0x93   : > { %4360 = vmatpush.bf16.msra.mxu3 %v4209_v34  ;;  %2527 = vmatpush.bf16.msra.mxu1 %v4209_v34  ;;  %v4140_v34 = vld [vmem:[#allocation3 + $0x54] sm:$0xf0]  ;;  %v3425_v14 = vld [vmem:[#allocation3 + $0x178] sm:$0xf0] }
  0x94   : > { %v3280_v23 = vor.u32 %v4140_v34, %v3279_v20  ;;  %v4288_v33 = vld [vmem:[%s4459_s24 + $0x2b8] sm:$0xff]  ;;  %v4287_v20 = vld [vmem:[%s4459_s24 + $0x2b0] sm:$0xff] }
  0x95   : > { %2509 = vmatmul.bf16.vlgmr.msra.gmra.mxu2 %v3408_v28  ;;  %2499 = vmatmul.bf16.vlgmr.msra.gmra.mxu0 %v3264_v30  ;;  %v4271_v28 = vld [vmem:[%s4459_s24 + $0x230] sm:$0xff]  ;;  %v4254_v30 = vld [vmem:[%s4459_s24 + $0x1a8] sm:$0xff]  ;;  %v4304_v34 = vld [vmem:[%s4459_s24 + $0x338] sm:$0xff] }
  0x96   : > { %2549 = vmatpush.bf16.msrb.mxu2 %v4224_v47  ;;  %2538 = vmatmul.bf16.vlgmr.msra.gmra.mxu3 %v3412_v52  ;;  %v4255_v47 = vld [vmem:[%s4459_s24 + $0x1b0] sm:$0xff]  ;;  %v4312_v38 = vld [vmem:[%s4459_s24 + $0x378] sm:$0xff] }
  0x97   : > { %2578 = vmatpush.bf16.msrb.mxu3 %v4232_v48  ;;  %2528 = vmatmul.bf16.vlgmr.msra.gmra.mxu1 %v3268_v31  ;;  %v4263_v48 = vld [vmem:[%s4459_s24 + $0x1f0] sm:$0xff]  ;;  %v4262_v31 = vld [vmem:[%s4459_s24 + $0x1e8] sm:$0xff] }
  0x98   : > { %2607 = vmatpush.bf16.msrb.mxu0 %v4240_v55  ;;  %2636 = vmatpush.bf16.msrb.mxu1 %v4248_v60  ;;  %v4279_v52 = vld [vmem:[%s4459_s24 + $0x270] sm:$0xff]  ;;  %v4270_v55 = vld [vmem:[%s4459_s24 + $0x228] sm:$0xff] }
  0x99   : > { %v4278_v60 = vld [vmem:[%s4459_s24 + $0x268] sm:$0xff] }
  0x9a   : > { %2550 = vmatpush.bf16.msrb.mxu2 %v4223_v61  ;;  %v4253_v61 = vld [vmem:[%s4459_s24 + $0x1a0] sm:$0xff] }
  0x9b   : > { %2579 = vmatpush.bf16.msrb.mxu3 %v4231_v63  ;;  %v4261_v63 = vld [vmem:[%s4459_s24 + $0x1e0] sm:$0xff] }
  0x9c   : > { %2608 = vmatpush.bf16.msrb.mxu0 %v4239_v37  ;;  %2637 = vmatpush.bf16.msrb.mxu1 %v4247_v2  ;;  %v3343_v37 = vld [vmem:[#allocation3 + $0x98] sm:$0xf]  ;;  %v4269_v2 = vld [vmem:[%s4459_s24 + $0x220] sm:$0xff] }
  0x9e   : > { %2551 = vmatpush.bf16.msrb.mxu2 %v4222_v1  ;;  %v4277_v1 = vld [vmem:[%s4459_s24 + $0x260] sm:$0xff] }
  0x9f   : > { %2580 = vmatpush.bf16.msrb.mxu3 %v4230_v43  ;;  %v4157_v43 = vld [vmem:[#allocation3 + $0xdc] sm:$0xf0] }
  0xa0   : > { %2609 = vmatpush.bf16.msrb.mxu0 %v4238_v44  ;;  %2638 = vmatpush.bf16.msrb.mxu1 %v4246_v57  ;;  %v4148_v44 = vld [vmem:[#allocation3 + $0x9c] sm:$0xf]  ;;  %v3345_v57 = vld [vmem:[#allocation3 + $0xe0] sm:$0xf0]  ;;  %v3344_v10 = vor.u32 %v4157_v43, %v3343_v37  ;;  %v4310_v43 = vld [vmem:[%s4459_s24 + $0x368] sm:$0xff] }
  0xa1   : > { %v3348_v62 = vor.u32 %v4148_v44, %v3345_v57  ;;  %v4285_v37 = vld [vmem:[%s4459_s24 + $0x2a0] sm:$0xff]  ;;  %v3287_v44 = vld [vmem:[#allocation3 + $0x18] sm:$0xf] }
  0xa2   : > { %2552 = vmatpush.bf16.msrb.mxu2 %v4221_v45  ;;  %v3351_v45 = vld [vmem:[#allocation3 + $0xa0] sm:$0xf] }
  0xa3   : > { %2581 = vmatpush.bf16.msrb.mxu3 %v4229_v12  ;;  %v4158_v12 = vld [vmem:[#allocation3 + $0xe4] sm:$0xf0]  ;;  %v4141_v57 = vld [vmem:[#allocation3 + $0x5c] sm:$0xf0] }
  0xa4   : > { %2610 = vmatpush.bf16.msrb.mxu0 %v4237_v0  ;;  %2639 = vmatpush.bf16.msrb.mxu1 %v4245_v36  ;;  %v4149_v0 = vld [vmem:[#allocation3 + $0xa4] sm:$0xf]  ;;  %v4276_v36 = vld [vmem:[%s4459_s24 + $0x258] sm:$0xff]  ;;  %v3352_v19 = vor.u32 %v4158_v12, %v3351_v45 }
  0xa5   : > { %2514 = vmatmul.bf16.gmra.mxu2 %v3480_v54  ;;  %2504 = vmatmul.bf16.gmra.mxu0 %v3336_v29  ;;  %v3356_v49 = vor.u32 %v4149_v0, %v3353_v6  ;;  %v4267_v54 = vld [vmem:[%s4459_s24 + $0x210] sm:$0xff]  ;;  %v4258_v29 = vld [vmem:[%s4459_s24 + $0x1c8] sm:$0xff]  ;;  %v4132_v45 = vld [vmem:[#allocation3 + $0x1c] sm:$0xf] }
  0xa6   : > { %2553 = vmatpush.bf16.msrb.mxu2 %v4220_v56  ;;  %2543 = vmatmul.bf16.gmra.mxu3 %v3484_v58  ;;  %v4251_v56 = vld [vmem:[%s4459_s24 + $0x190] sm:$0xff]  ;;  %v4250_v58 = vld [vmem:[%s4459_s24 + $0x188] sm:$0xff]  ;;  %v3289_v12 = vld [vmem:[#allocation3 + $0x60] sm:$0xf0] }
  0xa7   : > { %2582 = vmatpush.bf16.msrb.mxu3 %v4228_v50  ;;  %2533 = vmatmul.bf16.gmra.mxu1 %v3340_v17  ;;  %v4259_v50 = vld [vmem:[%s4459_s24 + $0x1d0] sm:$0xff]  ;;  %v3295_v0 = vld [vmem:[#allocation3 + $0x20] sm:$0xf]  ;;  %v4142_v6 = vld [vmem:[#allocation3 + $0x64] sm:$0xf0] }
  0xa8   : > { %2611 = vmatpush.bf16.msrb.mxu0 %v4236_v32  ;;  %2640 = vmatpush.bf16.msrb.mxu1 %v4244_v24  ;;  %v4275_v17 = vld [vmem:[%s4459_s24 + $0x250] sm:$0xff]  ;;  %v4266_v32 = vld [vmem:[%s4459_s24 + $0x208] sm:$0xff] }
  0xa9   : > { %v4274_v24 = vld [vmem:[%s4459_s24 + $0x248] sm:$0xff] }
  0xaa   : > { %2554 = vmatpush.bf16.msrb.mxu2 %v4219_v4  ;;  %v4249_v4 = vld [vmem:[%s4459_s24 + $0x180] sm:$0xff] }
  0xab   : > { %2583 = vmatpush.bf16.msrb.mxu3 %v4227_v53  ;;  %v4257_v53 = vld [vmem:[%s4459_s24 + $0x1c0] sm:$0xff] }
  0xac   : > { %2612 = vmatpush.bf16.msrb.mxu0 %v4235_v51  ;;  %2641 = vmatpush.bf16.msrb.mxu1 %v4243_v18  ;;  %v4265_v51 = vld [vmem:[%s4459_s24 + $0x200] sm:$0xff]  ;;  %v3415_v18 = vld [vmem:[#allocation3 + $0x128] sm:$0xf] }
  0xae   : > { %2555 = vmatpush.bf16.msrb.mxu2 %v4218_v25  ;;  %v4175_v25 = vld [vmem:[#allocation3 + $0x16c] sm:$0xf0] }
  0xaf   : > { %2584 = vmatpush.bf16.msrb.mxu3 %v4226_v59  ;;  %v4166_v59 = vld [vmem:[#allocation3 + $0x12c] sm:$0xf]  ;;  %v3416_v15 = vor.u32 %v4175_v25, %v3415_v18  ;;  %v4151_v18 = vld [vmem:[#allocation3 + $0xb4] sm:$0xf]  ;;  %v3369_v25 = vld [vmem:[#allocation3 + $0xf8] sm:$0xf0] }
  0xb0   : > { %2613 = vmatpush.bf16.msrb.mxu0 %v4234_v8  ;;  %2642 = vmatpush.bf16.msrb.mxu1 %v4242_v40  ;;  %v3417_v8 = vld [vmem:[#allocation3 + $0x170] sm:$0xf0]  ;;  %v4176_v40 = vld [vmem:[#allocation3 + $0x174] sm:$0xf0] }
  0xb2   : > { %2556 = vmatpush.bf16.msrb.mxu2 %v4217_v3  ;;  %v3423_v3 = vld [vmem:[#allocation3 + $0x130] sm:$0xf] }
  0xb3   : > { %2585 = vmatpush.bf16.msrb.mxu3 %v4225_v5  ;;  %v4167_v5 = vld [vmem:[#allocation3 + $0x134] sm:$0xf]  ;;  %v3424_v21 = vor.u32 %v4176_v40, %v3423_v3  ;;  %v4308_v3 = vld [vmem:[%s4459_s24 + $0x358] sm:$0xff] }
  0xb4   : > { %2614 = vmatpush.bf16.msrb.mxu0 %v4233_v16  ;;  %2643 = vmatpush.bf16.msrb.mxu1 %v4241_v11  ;;  %v3420_v16 = vor.u32 %v4166_v59, %v3417_v8  ;;  %v4296_v11 = vld [vmem:[%s4459_s24 + $0x2f8] sm:$0xff] }
  0xb5   : > { %2557 = vmatmul.bf16.vlgmr.msrb.gmra.mxu2 %v3272_v41  ;;  %v4184_v41 = vld [vmem:[#allocation3 + $0x1bc] sm:$0xf] }
  0xb6   : > { %2665 = vmatpush.bf16.msra.mxu2 %v4256_v27  ;;  %2586 = vmatmul.bf16.vlgmr.msrb.gmra.mxu3 %v3276_v42  ;;  %v3428_v27 = vor.u32 %v4167_v5, %v3425_v14  ;;  %v3489_v42 = vld [vmem:[#allocation3 + $0x200] sm:$0xf0]  ;;  %v3372_v5 = vor.u32 %v4151_v18, %v3369_v25  ;;  %v4282_v14 = vld [vmem:[%s4459_s24 + $0x288] sm:$0xff]  ;;  %v4335_v18 = vld [vmem:[%s4459_s24 + $0x430] sm:$0xff] }
  0xb7   : > { %2694 = vmatpush.bf16.msra.mxu3 %v4264_v26  ;;  %2615 = vmatmul.bf16.vlgmr.msrb.gmra.mxu0 %v3280_v23  ;;  %v4273_v26 = vld [vmem:[%s4459_s24 + $0x240] sm:$0xff] }
  0xb8   : > { %2723 = vmatpush.bf16.msra.mxu0 %v4272_v7  ;;  %2752 = vmatpush.bf16.msra.mxu1 %v4280_v39  ;;  %v3487_v7 = vld [vmem:[#allocation3 + $0x1b8] sm:$0xf]  ;;  %v4193_v39 = vld [vmem:[#allocation3 + $0x1fc] sm:$0xf0] }
  0xb9   : > { %2644 = vmatmul.bf16.vlgmr.msrb.gmra.mxu1 %v3284_v46  ;;  %v3495_v23 = vld [vmem:[#allocation3 + $0x1c0] sm:$0xf]  ;;  %v4194_v46 = vld [vmem:[#allocation3 + $0x204] sm:$0xf0] }
  0xba   : > { %2666 = vmatpush.bf16.msra.mxu2 %v4255_v47  ;;  %v4185_v47 = vld [vmem:[#allocation3 + $0x1c4] sm:$0xf] }
  0xbb   : > { %2695 = vmatpush.bf16.msra.mxu3 %v4263_v48  ;;  %v3497_v48 = vld [vmem:[#allocation3 + $0x208] sm:$0xf0] }
  0xbc   : > { %2724 = vmatpush.bf16.msra.mxu0 %v4271_v28  ;;  %2753 = vmatpush.bf16.msra.mxu1 %v4279_v52  ;;  %v3488_v28 = vor.u32 %v4193_v39, %v3487_v7  ;;  %v3492_v52 = vor.u32 %v4184_v41, %v3489_v42  ;;  %v4178_v7 = vld [vmem:[#allocation3 + $0x184] sm:$0xf0]  ;;  %v4169_v39 = vld [vmem:[#allocation3 + $0x144] sm:$0xf]  ;;  %v3441_v41 = vld [vmem:[#allocation3 + $0x188] sm:$0xf0] }
  0xbd   : > { %v4306_v42 = vld [vmem:[%s4459_s24 + $0x348] sm:$0xff] }
  0xbe   : > { %2667 = vmatpush.bf16.msra.mxu2 %v4254_v30  ;;  %v3496_v30 = vor.u32 %v4194_v46, %v3495_v23 }
  0xbf   : > { %2696 = vmatpush.bf16.msra.mxu3 %v4262_v31  ;;  %v3500_v31 = vor.u32 %v4185_v47, %v3497_v48  ;;  %v3444_v48 = vor.u32 %v4169_v39, %v3441_v41 }
  0xc0   : > { %2725 = vmatpush.bf16.msra.mxu0 %v4270_v55  ;;  %2754 = vmatpush.bf16.msra.mxu1 %v4278_v60  ;;  %v4286_v55 = vld [vmem:[%s4459_s24 + $0x2a8] sm:$0xff] }
  0xc1   : > { %v4294_v60 = vld [vmem:[%s4459_s24 + $0x2e8] sm:$0xff] }
  0xc2   : > { %2668 = vmatpush.bf16.msra.mxu2 %v4253_v61  ;;  %v4303_v61 = vld [vmem:[%s4459_s24 + $0x330] sm:$0xff] }
  0xc3   : > { %2697 = vmatpush.bf16.msra.mxu3 %v4261_v63  ;;  %v4311_v63 = vld [vmem:[%s4459_s24 + $0x370] sm:$0xff] }
  0xc4   : > { %2726 = vmatpush.bf16.msra.mxu0 %v4269_v2  ;;  %2755 = vmatpush.bf16.msra.mxu1 %v4277_v1  ;;  %v4293_v2 = vld [vmem:[%s4459_s24 + $0x2e0] sm:$0xff]  ;;  %v4302_v1 = vld [vmem:[%s4459_s24 + $0x328] sm:$0xff] }
  0xc5   : > { %2562 = vmatmul.bf16.gmra.mxu2 %v3344_v10  ;;  %v3296_v10 = vor.u32 %v4142_v6, %v3295_v0  ;;  %v4327_v0 = vld [vmem:[%s4459_s24 + $0x3f0] sm:$0xff]  ;;  %v4336_v6 = vld [vmem:[%s4459_s24 + $0x438] sm:$0xff] }
  0xc6   : > { %2669 = vmatpush.bf16.msra.mxu2 %v4252_v13  ;;  %2591 = vmatmul.bf16.gmra.mxu3 %v3348_v62  ;;  %v4133_v13 = vld [vmem:[#allocation3 + $0x24] sm:$0xf] }
  0xc7   : > { %2698 = vmatpush.bf16.msra.mxu3 %v4260_v9  ;;  %2620 = vmatmul.bf16.gmra.mxu0 %v3352_v19  ;;  %v3297_v9 = vld [vmem:[#allocation3 + $0x68] sm:$0xf0]  ;;  %v4284_v19 = vld [vmem:[%s4459_s24 + $0x298] sm:$0xff] }
  0xc8   : > { %2727 = vmatpush.bf16.msra.mxu0 %v4268_v22  ;;  %2756 = vmatpush.bf16.msra.mxu1 %v4276_v36  ;;  %v3288_v22 = vor.u32 %v4141_v57, %v3287_v44  ;;  %v3292_v36 = vor.u32 %v4132_v45, %v3289_v12  ;;  %v3300_v62 = vor.u32 %v4133_v13, %v3297_v9  ;;  %v3503_v57 = vld [vmem:[#allocation3 + $0x1c8] sm:$0xf]  ;;  %v4195_v45 = vld [vmem:[#allocation3 + $0x20c] sm:$0xf0]  ;;  %v4186_v13 = vld [vmem:[#allocation3 + $0x1cc] sm:$0xf] }
  0xc9   : > { %2649 = vmatmul.bf16.gmra.mxu1 %v3356_v49  ;;  %v4292_v49 = vld [vmem:[%s4459_s24 + $0x2d8] sm:$0xff]  ;;  %v4319_v12 = vld [vmem:[%s4459_s24 + $0x3b0] sm:$0xff] }
  0xca   : > { %2670 = vmatpush.bf16.msra.mxu2 %v4251_v56  ;;  %v4301_v56 = vld [vmem:[%s4459_s24 + $0x320] sm:$0xff]  ;;  %v3505_v9 = vld [vmem:[#allocation3 + $0x210] sm:$0xf0] }
  0xcb   : > { %2699 = vmatpush.bf16.msra.mxu3 %v4259_v50  ;;  %v4309_v50 = vld [vmem:[%s4459_s24 + $0x360] sm:$0xff] }
  0xcc   : > { %2728 = vmatpush.bf16.msra.mxu0 %v4267_v54  ;;  %2757 = vmatpush.bf16.msra.mxu1 %v4275_v17  ;;  %v4283_v54 = vld [vmem:[%s4459_s24 + $0x290] sm:$0xff]  ;;  %v3359_v17 = vld [vmem:[#allocation3 + $0xa8] sm:$0xf] }
  0xce   : > { %2671 = vmatpush.bf16.msra.mxu2 %v4250_v58  ;;  %v4291_v58 = vld [vmem:[%s4459_s24 + $0x2d0] sm:$0xff] }
  0xcf   : > { %2700 = vmatpush.bf16.msra.mxu3 %v4258_v29  ;;  %v4300_v29 = vld [vmem:[%s4459_s24 + $0x318] sm:$0xff] }
  0xd0   : > { %2729 = vmatpush.bf16.msra.mxu0 %v4266_v32  ;;  %2758 = vmatpush.bf16.msra.mxu1 %v4274_v24  ;;  %v4159_v32 = vld [vmem:[#allocation3 + $0xec] sm:$0xf0]  ;;  %v4150_v24 = vld [vmem:[#allocation3 + $0xac] sm:$0xf] }
  0xd1   : > { %v3360_v59 = vor.u32 %v4159_v32, %v3359_v17 }
  0xd2   : > { %2672 = vmatpush.bf16.msra.mxu2 %v4249_v4  ;;  %v3361_v4 = vld [vmem:[#allocation3 + $0xf0] sm:$0xf0] }
  0xd3   : > { %2701 = vmatpush.bf16.msra.mxu3 %v4257_v53  ;;  %v3367_v53 = vld [vmem:[#allocation3 + $0xb0] sm:$0xf]  ;;  %v3364_v8 = vor.u32 %v4150_v24, %v3361_v4  ;;  %v4344_v4 = vld [vmem:[%s4459_s24 + $0x478] sm:$0xff] }
  0xd4   : > { %2730 = vmatpush.bf16.msra.mxu0 %v4265_v51  ;;  %2759 = vmatpush.bf16.msra.mxu1 %v4273_v26  ;;  %v4160_v51 = vld [vmem:[#allocation3 + $0xf4] sm:$0xf0]  ;;  %v4289_v26 = vld [vmem:[%s4459_s24 + $0x2c0] sm:$0xff] }
  0xd5   : > { %2567 = vmatmul.bf16.gmra.mxu2 %v3416_v15  ;;  %v3368_v40 = vor.u32 %v4160_v51, %v3367_v53  ;;  %v4290_v15 = vld [vmem:[%s4459_s24 + $0x2c8] sm:$0xff] }
  0xd6   : > { %2596 = vmatmul.bf16.gmra.mxu3 %v3420_v16  ;;  %2781 = vmatpush.bf16.msrb.mxu2 %v4288_v33  ;;  %v4299_v16 = vld [vmem:[%s4459_s24 + $0x310] sm:$0xff]  ;;  %v4298_v33 = vld [vmem:[%s4459_s24 + $0x308] sm:$0xff] }
  0xd7   : > { %2625 = vmatmul.bf16.gmra.mxu0 %v3424_v21  ;;  %2810 = vmatpush.bf16.msrb.mxu3 %v4296_v11  ;;  %v4307_v21 = vld [vmem:[%s4459_s24 + $0x350] sm:$0xff]  ;;  %v3431_v11 = vld [vmem:[#allocation3 + $0x138] sm:$0xf]  ;;  %v4318_v53 = vld [vmem:[%s4459_s24 + $0x3a8] sm:$0xff] }
  0xd8   : > { %2839 = vmatpush.bf16.msrb.mxu0 %v4304_v34  ;;  %2868 = vmatpush.bf16.msrb.mxu1 %v4312_v38  ;;  %v4168_v34 = vld [vmem:[#allocation3 + $0x13c] sm:$0xf]  ;;  %v3439_v38 = vld [vmem:[#allocation3 + $0x140] sm:$0xf]  ;;  %v4326_v51 = vld [vmem:[%s4459_s24 + $0x3e8] sm:$0xff] }
  0xd9   : > { %2654 = vmatmul.bf16.gmra.mxu1 %v3428_v27  ;;  %v4281_v27 = vld [vmem:[%s4459_s24 + $0x280] sm:$0xff]  ;;  %v3440_v47 = vor.u32 %v4178_v7, %v3439_v38  ;;  %v3313_v38 = vld [vmem:[#allocation3 + $0x78] sm:$0xf0] }
  0xda   : > { %2782 = vmatpush.bf16.msrb.mxu2 %v4287_v20  ;;  %v4177_v20 = vld [vmem:[#allocation3 + $0x17c] sm:$0xf0] }
  0xdb   : > { %2811 = vmatpush.bf16.msrb.mxu3 %v4295_v35  ;;  %v3433_v35 = vld [vmem:[#allocation3 + $0x180] sm:$0xf0]  ;;  %v3432_v23 = vor.u32 %v4177_v20, %v3431_v11  ;;  %v3311_v11 = vld [vmem:[#allocation3 + $0x30] sm:$0xf]  ;;  %v4334_v20 = vld [vmem:[%s4459_s24 + $0x428] sm:$0xff] }
  0xdc   : > { %2840 = vmatpush.bf16.msrb.mxu0 %v4303_v61  ;;  %2869 = vmatpush.bf16.msrb.mxu1 %v4311_v63  ;;  %v3436_v46 = vor.u32 %v4168_v34, %v3433_v35  ;;  %v4328_v61 = vld [vmem:[%s4459_s24 + $0x3f8] sm:$0xff]  ;;  %v4135_v35 = vld [vmem:[#allocation3 + $0x34] sm:$0xf] }
  0xdd   : > { %v4144_v34 = vld [vmem:[#allocation3 + $0x74] sm:$0xf0] }
  0xde   : > { %2783 = vmatpush.bf16.msrb.mxu2 %v4286_v55  ;;  %v4305_v55 = vld [vmem:[%s4459_s24 + $0x340] sm:$0xff] }
  0xdf   : > { %2812 = vmatpush.bf16.msrb.mxu3 %v4294_v60  ;;  %v4320_v60 = vld [vmem:[%s4459_s24 + $0x3b8] sm:$0xff] }
  0xe0   : > { %2841 = vmatpush.bf16.msrb.mxu0 %v4302_v1  ;;  %2870 = vmatpush.bf16.msrb.mxu1 %v4310_v43 }
  0xe2   : > { %2784 = vmatpush.bf16.msrb.mxu2 %v4285_v37 }
  0xe3   : > { %2813 = vmatpush.bf16.msrb.mxu3 %v4293_v2 }
  0xe4   : > { %2842 = vmatpush.bf16.msrb.mxu0 %v4301_v56  ;;  %2871 = vmatpush.bf16.msrb.mxu1 %v4309_v50  ;;  %v3504_v50 = vor.u32 %v4195_v45, %v3503_v57  ;;  %v3375_v45 = vld [vmem:[#allocation3 + $0xb8] sm:$0xf] }
  0xe5   : > { %2572 = vmatmul.bf16.gmra.mxu2 %v3488_v28  ;;  %v4297_v28 = vld [vmem:[%s4459_s24 + $0x300] sm:$0xff] }
  0xe6   : > { %2601 = vmatmul.bf16.gmra.mxu3 %v3492_v52  ;;  %2785 = vmatpush.bf16.msrb.mxu2 %v4284_v19 }
  0xe7   : > { %2630 = vmatmul.bf16.gmra.mxu0 %v3496_v30  ;;  %2814 = vmatpush.bf16.msrb.mxu3 %v4292_v49 }
  0xe8   : > { %2843 = vmatpush.bf16.msrb.mxu0 %v4300_v29  ;;  %2872 = vmatpush.bf16.msrb.mxu1 %v4308_v3 }
  0xe9   : > { %2659 = vmatmul.bf16.gmra.mxu1 %v3500_v31 }
  0xea   : > { %2786 = vmatpush.bf16.msrb.mxu2 %v4283_v54  ;;  %v3508_v54 = vor.u32 %v4186_v13, %v3505_v9  ;;  %v4341_v13 = vld [vmem:[%s4459_s24 + $0x460] sm:$0xff]  ;;  %v4315_v9 = vld [vmem:[%s4459_s24 + $0x390] sm:$0xff] }
  0xeb   : > { %2815 = vmatpush.bf16.msrb.mxu3 %v4291_v58 }
  0xec   : > { %2844 = vmatpush.bf16.msrb.mxu0 %v4299_v16  ;;  %2873 = vmatpush.bf16.msrb.mxu1 %v4307_v21  ;;  %v4134_v16 = vld [vmem:[#allocation3 + $0x2c] sm:$0xf]  ;;  %v4343_v21 = vld [vmem:[%s4459_s24 + $0x470] sm:$0xff] }
  0xee   : > { %2787 = vmatpush.bf16.msrb.mxu2 %v4282_v14  ;;  %v3303_v14 = vld [vmem:[#allocation3 + $0x28] sm:$0xf] }
  0xef   : > { %2816 = vmatpush.bf16.msrb.mxu3 %v4290_v15  ;;  %v4143_v15 = vld [vmem:[#allocation3 + $0x6c] sm:$0xf0] }
  0xf0   : > { %2845 = vmatpush.bf16.msrb.mxu0 %v4298_v33  ;;  %2874 = vmatpush.bf16.msrb.mxu1 %v4306_v42  ;;  %v3305_v33 = vld [vmem:[#allocation3 + $0x70] sm:$0xf0]  ;;  %v3304_v42 = vor.u32 %v4143_v15, %v3303_v14  ;;  %v4322_v14 = vld [vmem:[%s4459_s24 + $0x3c8] sm:$0xff] }
  0xf1   : > { %v4331_v15 = vld [vmem:[%s4459_s24 + $0x410] sm:$0xff] }
  0xf2   : > { %2788 = vmatpush.bf16.msrb.mxu2 %v4281_v27  ;;  %v4317_v27 = vld [vmem:[%s4459_s24 + $0x3a0] sm:$0xff] }
  0xf3   : > { %2817 = vmatpush.bf16.msrb.mxu3 %v4289_v26  ;;  %v4325_v26 = vld [vmem:[%s4459_s24 + $0x3e0] sm:$0xff] }
  0xf4   : > { %2846 = vmatpush.bf16.msrb.mxu0 %v4297_v28  ;;  %2875 = vmatpush.bf16.msrb.mxu1 %v4305_v55  ;;  %v4324_v55 = vld [vmem:[%s4459_s24 + $0x3d8] sm:$0xff] }
  0xf5   : > { %2673 = vmatmul.bf16.vlgmr.msra.gmra.mxu2 %v3288_v22  ;;  %v3511_v22 = vld [vmem:[#allocation3 + $0x1d0] sm:$0xf] }
  0xf6   : > { %2702 = vmatmul.bf16.vlgmr.msra.gmra.mxu3 %v3292_v36  ;;  %2897 = vmatpush.bf16.msra.mxu2 %v4320_v60  ;;  %v4196_v36 = vld [vmem:[#allocation3 + $0x214] sm:$0xf0]  ;;  %v4333_v60 = vld [vmem:[%s4459_s24 + $0x420] sm:$0xff] }
  0xf7   : > { %2731 = vmatmul.bf16.vlgmr.msra.gmra.mxu0 %v3296_v10  ;;  %2926 = vmatpush.bf16.msra.mxu3 %v4328_v61  ;;  %v4187_v10 = vld [vmem:[#allocation3 + $0x1d4] sm:$0xf]  ;;  %v3512_v58 = vor.u32 %v4196_v36, %v3511_v22  ;;  %v3377_v36 = vld [vmem:[#allocation3 + $0x100] sm:$0xf0] }
  0xf8   : > { %2955 = vmatpush.bf16.msra.mxu0 %v4336_v6  ;;  %v4323_v22 = vld [vmem:[%s4459_s24 + $0x3d0] sm:$0xff] }
  0xf9   : > { %2760 = vmatmul.bf16.vlgmr.msra.gmra.mxu1 %v3300_v62  ;;  %v3513_v62 = vld [vmem:[#allocation3 + $0x218] sm:$0xf0] }
  0xfa   : > { %2898 = vmatpush.bf16.msra.mxu2 %v4319_v12  ;;  %v3516_v29 = vor.u32 %v4187_v10, %v3513_v62  ;;  %2984 = vmatpush.bf16.msra.mxu1 %v4344_v4  ;;  %v4161_v12 = vld [vmem:[#allocation3 + $0xfc] sm:$0xf0]  ;;  %v4332_v62 = vld [vmem:[%s4459_s24 + $0x418] sm:$0xff] }
  0xfb   : > { %2927 = vmatpush.bf16.msra.mxu3 %v4327_v0  ;;  %v4152_v0 = vld [vmem:[#allocation3 + $0xbc] sm:$0xf]  ;;  %v3383_v10 = vld [vmem:[#allocation3 + $0xc0] sm:$0xf] }
  0xfc   : > { %2956 = vmatpush.bf16.msra.mxu0 %v4335_v18 }
  0xfe   : > { %2899 = vmatpush.bf16.msra.mxu2 %v4318_v53  ;;  %2985 = vmatpush.bf16.msra.mxu1 %v4343_v21 }
  0xff   : > { %2928 = vmatpush.bf16.msra.mxu3 %v4326_v51 }
 0x100   : > { %2957 = vmatpush.bf16.msra.mxu0 %v4334_v20  ;;  %v3447_v20 = vld [vmem:[#allocation3 + $0x148] sm:$0xf] }
 0x102   : > { %2900 = vmatpush.bf16.msra.mxu2 %v4317_v27 }
 0x103   : > { %2929 = vmatpush.bf16.msra.mxu3 %v4325_v26 }
 0x104   : > { %2958 = vmatpush.bf16.msra.mxu0 %v4333_v60  ;;  %v4338_v60 = vld [vmem:[%s4459_s24 + $0x448] sm:$0xff] }
 0x105   : > { %2678 = vmatmul.bf16.gmra.mxu2 %v3360_v59 }
 0x106   : > { %2707 = vmatmul.bf16.gmra.mxu3 %v3364_v8 }
 0x107   : > { %2736 = vmatmul.bf16.gmra.mxu0 %v3368_v40  ;;  %2930 = vmatpush.bf16.msra.mxu3 %v4324_v55 }
 0x108   : > { %2959 = vmatpush.bf16.msra.mxu0 %v4332_v62 }
 0x109   : > { %2765 = vmatmul.bf16.gmra.mxu1 %v3372_v5 }
 0x10b   : > { %2931 = vmatpush.bf16.msra.mxu3 %v4323_v22 }
 0x10c   : > { %2960 = vmatpush.bf16.msra.mxu0 %v4331_v15 }
 0x10f   : > { %2932 = vmatpush.bf16.msra.mxu3 %v4322_v14 }
 0x112   : > { %v2500_v52 = vpop.f32.mrf.mxu0 }
 0x114   : > { %v2529_v30 = vpop.f32.mrf.mxu1 }
 0x115   : > { %v5281_v31 = vadd.f32 %v2529_v30, %v2500_v52  ;;  %2683 = vmatmul.bf16.gmra.mxu2 %v3432_v23  ;;  %v3308_v23 = vor.u32 %v4134_v16, %v3305_v33  ;;  %v4342_v52 = vld [vmem:[%s4459_s24 + $0x468] sm:$0xff]  ;;  %v4316_v30 = vld [vmem:[%s4459_s24 + $0x398] sm:$0xff] }
 0x116   : > { %2712 = vmatmul.bf16.gmra.mxu3 %v3436_v46  ;;  %v3312_v46 = vor.u32 %v4144_v34, %v3311_v11  ;;  %2986 = vmatpush.bf16.msra.mxu1 %v4342_v52  ;;  %v4179_v34 = vld [vmem:[#allocation3 + $0x18c] sm:$0xf0]  ;;  %v3457_v52 = vld [vmem:[#allocation3 + $0x198] sm:$0xf0] }
 0x117   : > { %2741 = vmatmul.bf16.gmra.mxu0 %v3440_v47  ;;  %v3316_v47 = vor.u32 %v4135_v35, %v3313_v38  ;;  %2901 = vmatpush.bf16.msra.mxu2 %v4316_v30  ;;  %v4339_v35 = vld [vmem:[%s4459_s24 + $0x450] sm:$0xff] }
 0x118   : > { %v2510_v63 = vpop.f32.mrf.mxu2 }
 0x119   : > { %2770 = vmatmul.bf16.gmra.mxu1 %v3444_v48  ;;  %v2539_v37 = vpop.f32.mrf.mxu3 }
 0x11a   : > { %v5286_v2 = vadd.f32 %v2539_v37, %v2510_v63  ;;  %v2502_v1 = vpop.f32.mrf.mxu0  ;;  %2987 = vmatpush.bf16.msra.mxu1 %v4341_v13 }
 0x11b   : > { %2902 = vmatpush.bf16.msra.mxu2 %v4315_v9 }
 0x11c   : > { %v2531_v43 = vpop.f32.mrf.mxu1 }
 0x11d   : > { %v5288_v44 = vadd.f32 %v2531_v43, %v2502_v1 }
 0x120   : > { %v2512_v19 = vpop.f32.mrf.mxu2 }
 0x121   : > { %v2541_v49 = vpop.f32.mrf.mxu3 }
 0x122   : > { %v5293_v56 = vadd.f32 %v2541_v49, %v2512_v19  ;;  %v2505_v17 = vpop.f32.mrf.mxu0  ;;  %v4162_v19 = vld [vmem:[#allocation3 + $0x104] sm:$0xf0]  ;;  %v4153_v49 = vld [vmem:[#allocation3 + $0xc4] sm:$0xf] }
 0x123   : > { %v3384_v4 = vor.u32 %v4162_v19, %v3383_v10 }
 0x124   : > { %v2534_v32 = vpop.f32.mrf.mxu1 }
 0x125   : > { %v5295_v24 = vadd.f32 %v2534_v32, %v2505_v17  ;;  %2688 = vmatmul.bf16.gmra.mxu2 %v3504_v50  ;;  %v3385_v50 = vld [vmem:[#allocation3 + $0x108] sm:$0xf0]  ;;  %v3376_v17 = vor.u32 %v4161_v12, %v3375_v45  ;;  %v3380_v32 = vor.u32 %v4152_v0, %v3377_v36 }
 0x126   : > { %2717 = vmatmul.bf16.gmra.mxu3 %v3508_v54  ;;  %v3388_v53 = vor.u32 %v4153_v49, %v3385_v50  ;;  %v3519_v50 = vld [vmem:[#allocation3 + $0x1d8] sm:$0xf] }
 0x127   : > { %2746 = vmatmul.bf16.gmra.mxu0 %v3512_v58 }
 0x128   : > { %v2515_v25 = vpop.f32.mrf.mxu2 }
 0x129   : > { %2775 = vmatmul.bf16.gmra.mxu1 %v3516_v29  ;;  %v2544_v59 = vpop.f32.mrf.mxu3 }
 0x12a   : > { %v5301_v8 = vadd.f32 %v2544_v59, %v2515_v25  ;;  %v2507_v3 = vpop.f32.mrf.mxu0 }
 0x12c   : > { %v2536_v40 = vpop.f32.mrf.mxu1 }
 0x12d   : > { %v5303_v5 = vadd.f32 %v2536_v40, %v2507_v3  ;;  %v4340_v3 = vld [vmem:[%s4459_s24 + $0x458] sm:$0xff]  ;;  %v4314_v40 = vld [vmem:[%s4459_s24 + $0x388] sm:$0xff] }
 0x12e   : > { %2988 = vmatpush.bf16.msra.mxu1 %v4340_v3  ;;  %2903 = vmatpush.bf16.msra.mxu2 %v4314_v40 }
 0x130   : > { %v2517_v7 = vpop.f32.mrf.mxu2 }
 0x131   : > { %v2546_v39 = vpop.f32.mrf.mxu3 }
 0x132   : > { %v5309_v41 = vadd.f32 %v2546_v39, %v2517_v7  ;;  %v4313_v7 = vld [vmem:[%s4459_s24 + $0x380] sm:$0xff]  ;;  %2989 = vmatpush.bf16.msra.mxu1 %v4339_v35 }
 0x133   : > { %v4321_v39 = vld [vmem:[%s4459_s24 + $0x3c0] sm:$0xff]  ;;  %2904 = vmatpush.bf16.msra.mxu2 %v4313_v7  ;;  %v3319_v7 = vld [vmem:[#allocation3 + $0x38] sm:$0xf] }
 0x134   : > { %v2616_v48 = vpop.f32.mrf.mxu0  ;;  %2933 = vmatpush.bf16.msra.mxu3 %v4321_v39  ;;  %v4145_v39 = vld [vmem:[#allocation3 + $0x7c] sm:$0xf0] }
 0x135   : > { %2789 = vmatmul.bf16.vlgmr.msrb.gmra.mxu2 %v3304_v42  ;;  %v4330_v42 = vld [vmem:[%s4459_s24 + $0x408] sm:$0xff] }
 0x136   : > { %v2645_v28 = vpop.f32.mrf.mxu1  ;;  %2818 = vmatmul.bf16.vlgmr.msrb.gmra.mxu3 %v3308_v23  ;;  %v4170_v23 = vld [vmem:[#allocation3 + $0x14c] sm:$0xf]  ;;  %2961 = vmatpush.bf16.msra.mxu0 %v4330_v42  ;;  %v4136_v42 = vld [vmem:[#allocation3 + $0x3c] sm:$0xf] }
 0x137   : > { %2847 = vmatmul.bf16.vlgmr.msrb.gmra.mxu0 %v3312_v46  ;;  %v3449_v46 = vld [vmem:[#allocation3 + $0x190] sm:$0xf0]  ;;  %2990 = vmatpush.bf16.msra.mxu1 %v4338_v60 }
 0x138   : > { %v2558_v61 = vpop.f32.mrf.mxu2 }
 0x139   : > { %2876 = vmatmul.bf16.vlgmr.msrb.gmra.mxu1 %v3316_v47  ;;  %v2587_v63 = vpop.f32.mrf.mxu3  ;;  %v2559_v37 = vadd.f32 %v2558_v61, %v5281_v31  ;;  %v3455_v47 = vld [vmem:[#allocation3 + $0x150] sm:$0xf] }
 0x13b   : > { %v2588_v1 = vadd.f32 %v2587_v63, %v2559_v37  ;;  %v3448_v63 = vor.u32 %v4179_v34, %v3447_v20  ;;  %v3452_v37 = vor.u32 %v4170_v23, %v3449_v46  ;;  %v3321_v23 = vld [vmem:[#allocation3 + $0x80] sm:$0xf0]  ;;  %v3327_v46 = vld [vmem:[#allocation3 + $0x40] sm:$0xf] }
 0x13c   : > { %v2618_v43 = vpop.f32.mrf.mxu0 }
 0x13d   : > { %v2617_v6 = vadd.f32 %v2616_v48, %v2588_v1  ;;  %v4180_v48 = vld [vmem:[#allocation3 + $0x194] sm:$0xf0] }
 0x13e   : > { %v2647_v57 = vpop.f32.mrf.mxu1  ;;  %v3456_v1 = vor.u32 %v4180_v48, %v3455_v47  ;;  %v4146_v47 = vld [vmem:[#allocation3 + $0x84] sm:$0xf0]  ;;  %v4137_v48 = vld [vmem:[#allocation3 + $0x44] sm:$0xf] }
 0x13f   : > { %v5320_v54 = vadd.f32 %v2645_v28, %v2617_v6  ;;  %v4171_v28 = vld [vmem:[#allocation3 + $0x154] sm:$0xf]  ;;  %v4337_v6 = vld [vmem:[%s4459_s24 + $0x440] sm:$0xff] }
 0x140   : > { %v2560_v31 = vpop.f32.mrf.mxu2  ;;  %2991 = vmatpush.bf16.msra.mxu1 %v4337_v6 }
 0x141   : > { %v2589_v58 = vpop.f32.mrf.mxu3  ;;  %v2561_v29 = vadd.f32 %v2560_v31, %v5288_v44  ;;  %v4197_v31 = vld [vmem:[#allocation3 + $0x21c] sm:$0xf0] }
 0x142   : > { %v3520_v3 = vor.u32 %v4197_v31, %v3519_v50  ;;  %v3399_v50 = vld [vmem:[#allocation3 + $0xd0] sm:$0xf]  ;;  %v4164_v31 = vld [vmem:[#allocation3 + $0x114] sm:$0xf0] }
 0x143   : > { %v2590_v51 = vadd.f32 %v2589_v58, %v2561_v29  ;;  %v4188_v58 = vld [vmem:[#allocation3 + $0x1dc] sm:$0xf]  ;;  %v3521_v29 = vld [vmem:[#allocation3 + $0x220] sm:$0xf0] }
 0x144   : > { %v2621_v18 = vpop.f32.mrf.mxu0 }
 0x145   : > { %v2619_v59 = vadd.f32 %v2618_v43, %v2590_v51  ;;  %2794 = vmatmul.bf16.gmra.mxu2 %v3376_v17  ;;  %v3460_v43 = vor.u32 %v4171_v28, %v3457_v52  ;;  %v3527_v17 = vld [vmem:[#allocation3 + $0x1e0] sm:$0xf]  ;;  %v3329_v28 = vld [vmem:[#allocation3 + $0x88] sm:$0xf0] }
 0x146   : > { %v2650_v25 = vpop.f32.mrf.mxu1  ;;  %2823 = vmatmul.bf16.gmra.mxu3 %v3380_v32  ;;  %v4198_v32 = vld [vmem:[#allocation3 + $0x224] sm:$0xf0] }
 0x147   : > { %2852 = vmatmul.bf16.gmra.mxu0 %v3384_v4  ;;  %v5327_v44 = vadd.f32 %v2647_v57, %v2619_v59  ;;  %v4329_v57 = vld [vmem:[%s4459_s24 + $0x400] sm:$0xff]  ;;  %v3528_v40 = vor.u32 %v4198_v32, %v3527_v17  ;;  %s4126_s24 = sshll.u32 (%p4450_p4), %s4439_s12, 3 }
 0x148   : > { %v2563_v16 = vpop.f32.mrf.mxu2  ;;  %2962 = vmatpush.bf16.msra.mxu0 %v4329_v57  ;;  %v4189_v4 = vld [vmem:[#allocation3 + $0x1e4] sm:$0xf]  ;;  %s3029_s4 = scalar_lea.vmem (%p4450_p4), %s5462_s2, %s4126_s24 }
 0x149   : > { %2881 = vmatmul.bf16.gmra.mxu1 %v3388_v53  ;;  %v2592_v21 = vpop.f32.mrf.mxu3  ;;  %v2564_v27 = vadd.f32 %v2563_v16, %v5295_v24  ;;  %v3529_v53 = vld [vmem:[#allocation3 + $0x228] sm:$0xf0] }
 0x14a   : > { %v3532_v14 = vor.u32 %v4189_v4, %v3529_v53 }
 0x14b   : > { %v2593_v26 = vadd.f32 %v2592_v21, %v2564_v27 }
 0x14c   : > { %v2623_v33 = vpop.f32.mrf.mxu0 }
 0x14d   : > { %v2622_v38 = vadd.f32 %v2621_v18, %v2593_v26 }
 0x14e   : > { %v2652_v11 = vpop.f32.mrf.mxu1 }
 0x14f   : > { %v5334_v24 = vadd.f32 %v2650_v25, %v2622_v38 }
 0x150   : > { %v2565_v30 = vpop.f32.mrf.mxu2 }
 0x151   : > { %v2594_v55 = vpop.f32.mrf.mxu3  ;;  %v2566_v61 = vadd.f32 %v2565_v30, %v5303_v5 }
 0x153   : > { %v2595_v45 = vadd.f32 %v2594_v55, %v2566_v61  ;;  %v3320_v61 = vor.u32 %v4145_v39, %v3319_v7  ;;  %v3471_v7 = vld [vmem:[#allocation3 + $0x160] sm:$0xf]  ;;  %v4182_v39 = vld [vmem:[#allocation3 + $0x1a4] sm:$0xf0] }
 0x154   : > { %v2626_v12 = vpop.f32.mrf.mxu0 }
 0x155   : > { %v2624_v13 = vadd.f32 %v2623_v33, %v2595_v45  ;;  %2799 = vmatmul.bf16.gmra.mxu2 %v3448_v63  ;;  %v3328_v63 = vor.u32 %v4146_v47, %v3327_v46 }
 0x156   : > { %v2655_v0 = vpop.f32.mrf.mxu1  ;;  %2828 = vmatmul.bf16.gmra.mxu3 %v3452_v37  ;;  %v3332_v37 = vor.u32 %v4137_v48, %v3329_v28 }
 0x157   : > { %2857 = vmatmul.bf16.gmra.mxu0 %v3456_v1  ;;  %v5340_v9 = vadd.f32 %v2652_v11, %v2624_v13 }
 0x158   : > { %v2568_v5 = vpop.f32.mrf.mxu2 }
 0x159   : > { %2886 = vmatmul.bf16.gmra.mxu1 %v3460_v43  ;;  %v2597_v22 = vpop.f32.mrf.mxu3  ;;  %v2569_v36 = vadd.f32 %v2568_v5, %v5286_v2  ;;  %v3524_v2 = vor.u32 %v4188_v58, %v3521_v29  ;;  %v4155_v58 = vld [vmem:[#allocation3 + $0xd4] sm:$0xf]  ;;  %v3401_v29 = vld [vmem:[#allocation3 + $0x118] sm:$0xf0] }
 0x15b   : > { %v2598_v10 = vadd.f32 %v2597_v22, %v2569_v36 }
 0x15c   : > { %v2628_v62 = vpop.f32.mrf.mxu0 }
 0x15d   : > { %v2627_v49 = vadd.f32 %v2626_v12, %v2598_v10  ;;  %v3391_v10 = vld [vmem:[#allocation3 + $0xc8] sm:$0xf] }
 0x15e   : > { %v2657_v19 = vpop.f32.mrf.mxu1 }
 0x15f   : > { %v5343_v51 = vadd.f32 %v2655_v0, %v2627_v49  ;;  %v3393_v49 = vld [vmem:[#allocation3 + $0x110] sm:$0xf0] }
 0x160   : > { %v2570_v18 = vpop.f32.mrf.mxu2 }
 0x161   : > { %v2599_v25 = vpop.f32.mrf.mxu3  ;;  %v2571_v59 = vadd.f32 %v2570_v18, %v5293_v56 }
 0x163   : > { %v2600_v15 = vadd.f32 %v2599_v25, %v2571_v59  ;;  %v3400_v25 = vor.u32 %v4164_v31, %v3399_v50  ;;  %v3404_v59 = vor.u32 %v4155_v58, %v3401_v29 }
 0x164   : > { %v2631_v16 = vpop.f32.mrf.mxu0 }
 0x165   : > { %v2629_v27 = vadd.f32 %v2628_v62, %v2600_v15  ;;  %2804 = vmatmul.bf16.gmra.mxu2 %v3520_v3  ;;  %v4163_v62 = vld [vmem:[#allocation3 + $0x10c] sm:$0xf0] }
 0x166   : > { %v2660_v21 = vpop.f32.mrf.mxu1  ;;  %2833 = vmatmul.bf16.gmra.mxu3 %v3524_v2  ;;  %v3392_v18 = vor.u32 %v4163_v62, %v3391_v10  ;;  %v3543_v10 = vld [vmem:[#allocation3 + $0x1f0] sm:$0xf]  ;;  %v4200_v62 = vld [vmem:[#allocation3 + $0x234] sm:$0xf0] }
 0x167   : > { %2862 = vmatmul.bf16.gmra.mxu0 %v3528_v40  ;;  %v5346_v26 = vadd.f32 %v2657_v19, %v2629_v27  ;;  %v4154_v19 = vld [vmem:[#allocation3 + $0xcc] sm:$0xf] }
 0x168   : > { %v2573_v33 = vpop.f32.mrf.mxu2 }
 0x169   : > { %2891 = vmatmul.bf16.gmra.mxu1 %v3532_v14  ;;  %v2602_v11 = vpop.f32.mrf.mxu3  ;;  %v2574_v20 = vadd.f32 %v2573_v33, %v5301_v8  ;;  %v3324_v8 = vor.u32 %v4136_v42, %v3321_v23  ;;  %v4173_v42 = vld [vmem:[#allocation3 + $0x164] sm:$0xf]  ;;  %v3473_v23 = vld [vmem:[#allocation3 + $0x1a8] sm:$0xf0] }
 0x16b   : > { %v2603_v34 = vadd.f32 %v2602_v11, %v2574_v20 }
 0x16c   : > { %v2633_v56 = vpop.f32.mrf.mxu0 }
 0x16d   : > { %v2632_v38 = vadd.f32 %v2631_v16, %v2603_v34  ;;  %v3463_v34 = vld [vmem:[#allocation3 + $0x158] sm:$0xf] }
 0x16e   : > { %v2662_v35 = vpop.f32.mrf.mxu1 }
 0x16f   : > { %v5349_v52 = vadd.f32 %v2660_v21, %v2632_v38  ;;  %v3465_v38 = vld [vmem:[#allocation3 + $0x1a0] sm:$0xf0] }
 0x170   : > { %v2575_v30 = vpop.f32.mrf.mxu2 }
 0x171   : > { %v2604_v55 = vpop.f32.mrf.mxu3  ;;  %v2576_v60 = vadd.f32 %v2575_v30, %v5309_v41 }
 0x173   : > { %v2605_v1 = vadd.f32 %v2604_v55, %v2576_v60  ;;  %v3472_v55 = vor.u32 %v4182_v39, %v3471_v7  ;;  %v3476_v60 = vor.u32 %v4173_v42, %v3473_v23 }
 0x174   : > { %v2732_v43 = vpop.f32.mrf.mxu0 }
 0x175   : > { %v2634_v45 = vadd.f32 %v2633_v56, %v2605_v1  ;;  %2905 = vmatmul.bf16.vlgmr.msra.gmra.mxu2 %v3320_v61  ;;  %v4181_v56 = vld [vmem:[#allocation3 + $0x19c] sm:$0xf0] }
 0x176   : > { %v2761_v57 = vpop.f32.mrf.mxu1  ;;  %2934 = vmatmul.bf16.vlgmr.msra.gmra.mxu3 %v3324_v8  ;;  %v3464_v30 = vor.u32 %v4181_v56, %v3463_v34 }
 0x177   : > { %2963 = vmatmul.bf16.vlgmr.msra.gmra.mxu0 %v3328_v63  ;;  %v5352_v12 = vadd.f32 %v2662_v35, %v2634_v45  ;;  %v4172_v35 = vld [vmem:[#allocation3 + $0x15c] sm:$0xf] }
 0x178   : > { %v2674_v0 = vpop.f32.mrf.mxu2 }
 0x179   : > { %2992 = vmatmul.bf16.vlgmr.msra.gmra.mxu1 %v3332_v37  ;;  %v2703_v6 = vpop.f32.mrf.mxu3  ;;  %v2675_v13 = vadd.f32 %v2674_v0, %v5320_v54  ;;  %v3396_v54 = vor.u32 %v4154_v19, %v3393_v49  ;;  %v4191_v19 = vld [vmem:[#allocation3 + $0x1f4] sm:$0xf]  ;;  %v3545_v49 = vld [vmem:[#allocation3 + $0x238] sm:$0xf0] }
 0x17b   : > { %v2704_v5 = vadd.f32 %v2703_v6, %v2675_v13 }
 0x17c   : > { %v2734_v41 = vpop.f32.mrf.mxu0 }
 0x17d   : > { %v2733_v36 = vadd.f32 %v2732_v43, %v2704_v5  ;;  %v3535_v5 = vld [vmem:[#allocation3 + $0x1e8] sm:$0xf] }
 0x17e   : > { %v2763_v22 = vpop.f32.mrf.mxu1 }
 0x17f   : > { %v5355_v17 = vadd.f32 %v2761_v57, %v2733_v36  ;;  %v3537_v36 = vld [vmem:[#allocation3 + $0x230] sm:$0xf0] }
 0x180   : > { %v2676_v32 = vpop.f32.mrf.mxu2 }
 0x181   : > { %v2705_v4 = vpop.f32.mrf.mxu3  ;;  %v2677_v53 = vadd.f32 %v2676_v32, %v5327_v44 }
 0x183   : > { %v2706_v3 = vadd.f32 %v2705_v4, %v2677_v53  ;;  %v3544_v4 = vor.u32 %v4200_v62, %v3543_v10  ;;  %v3548_v53 = vor.u32 %v4191_v19, %v3545_v49 }
 0x184   : > { %v2737_v2 = vpop.f32.mrf.mxu0 }
 0x185   : > { %v2735_v14 = vadd.f32 %v2734_v41, %v2706_v3  ;;  %2910 = vmatmul.bf16.gmra.mxu2 %v3392_v18  ;;  %v4199_v41 = vld [vmem:[#allocation3 + $0x22c] sm:$0xf0] }
 0x186   : > { %v2766_v40 = vpop.f32.mrf.mxu1  ;;  %2939 = vmatmul.bf16.gmra.mxu3 %v3396_v54  ;;  %v3536_v32 = vor.u32 %v4199_v41, %v3535_v5 }
 0x187   : > { %2968 = vmatmul.bf16.gmra.mxu0 %v3400_v25  ;;  %v5358_v15 = vadd.f32 %v2763_v22, %v2735_v14  ;;  %v4190_v22 = vld [vmem:[#allocation3 + $0x1ec] sm:$0xf] }
 0x188   : > { %v2679_v16 = vpop.f32.mrf.mxu2 }
 0x189   : > { %2997 = vmatmul.bf16.gmra.mxu1 %v3404_v59  ;;  %v2708_v21 = vpop.f32.mrf.mxu3  ;;  %v2680_v27 = vadd.f32 %v2679_v16, %v5334_v24  ;;  %v3468_v24 = vor.u32 %v4172_v35, %v3465_v38 }
 0x18b   : > { %v2709_v33 = vadd.f32 %v2708_v21, %v2680_v27 }
 0x18c   : > { %v2739_v44 = vpop.f32.mrf.mxu0 }
 0x18d   : > { %v2738_v20 = vadd.f32 %v2737_v2, %v2709_v33 }
 0x18e   : > { %v2768_v11 = vpop.f32.mrf.mxu1 }
 0x18f   : > { %v5361_v46 = vadd.f32 %v2766_v40, %v2738_v20 }
 0x190   : > { %v2681_v47 = vpop.f32.mrf.mxu2 }
 0x191   : > { %v2710_v48 = vpop.f32.mrf.mxu3  ;;  %v2682_v28 = vadd.f32 %v2681_v47, %v5340_v9 }
 0x193   : > { %v2711_v61 = vadd.f32 %v2710_v48, %v2682_v28 }
 0x194   : > { %v2742_v8 = vpop.f32.mrf.mxu0 }
 0x195   : > { %v2740_v37 = vadd.f32 %v2739_v44, %v2711_v61  ;;  %2915 = vmatmul.bf16.gmra.mxu2 %v3464_v30 }
 0x196   : > { %v2771_v63 = vpop.f32.mrf.mxu1  ;;  %2944 = vmatmul.bf16.gmra.mxu3 %v3468_v24 }
 0x197   : > { %2973 = vmatmul.bf16.gmra.mxu0 %v3472_v55  ;;  %v5364_v1 = vadd.f32 %v2768_v11, %v2740_v37 }
 0x198   : > { %v2684_v43 = vpop.f32.mrf.mxu2 }
 0x199   : > { %3002 = vmatmul.bf16.gmra.mxu1 %v3476_v60  ;;  %v2713_v57 = vpop.f32.mrf.mxu3  ;;  %v2685_v45 = vadd.f32 %v2684_v43, %v5343_v51  ;;  %v3540_v51 = vor.u32 %v4190_v22, %v3537_v36 }
 0x19b   : > { %v2714_v0 = vadd.f32 %v2713_v57, %v2685_v45 }
 0x19c   : > { %v2744_v9 = vpop.f32.mrf.mxu0 }
 0x19d   : > { %v2743_v13 = vadd.f32 %v2742_v8, %v2714_v0 }
 0x19e   : > { %v2773_v6 = vpop.f32.mrf.mxu1 }
 0x19f   : > { %v5367_v50 = vadd.f32 %v2771_v63, %v2743_v13 }
 0x1a0   : > { %v2686_v31 = vpop.f32.mrf.mxu2 }
 0x1a1   : > { %v2715_v58 = vpop.f32.mrf.mxu3  ;;  %v2687_v29 = vadd.f32 %v2686_v31, %v5346_v26 }
 0x1a3   : > { %v2716_v18 = vadd.f32 %v2715_v58, %v2687_v29 }
 0x1a4   : > { %v2747_v54 = vpop.f32.mrf.mxu0 }
 0x1a5   : > { %v2745_v59 = vadd.f32 %v2744_v9, %v2716_v18  ;;  %2920 = vmatmul.bf16.gmra.mxu2 %v3536_v32 }
 0x1a6   : > { %v2776_v25 = vpop.f32.mrf.mxu1  ;;  %2949 = vmatmul.bf16.gmra.mxu3 %v3540_v51 }
 0x1a7   : > { %2978 = vmatmul.bf16.gmra.mxu0 %v3544_v4  ;;  %v5370_v3 = vadd.f32 %v2773_v6, %v2745_v59 }
 0x1a8   : > { %v2689_v2 = vpop.f32.mrf.mxu2 }
 0x1a9   : > { %3007 = vmatmul.bf16.gmra.mxu1 %v3548_v53  ;;  %v2718_v40 = vpop.f32.mrf.mxu3  ;;  %v2690_v14 = vadd.f32 %v2689_v2, %v5349_v52 }
 0x1ab   : > { %v2719_v16 = vadd.f32 %v2718_v40, %v2690_v14 }
 0x1ac   : > { %v2749_v26 = vpop.f32.mrf.mxu0 }
 0x1ad   : > { %v2748_v27 = vadd.f32 %v2747_v54, %v2719_v16 }
 0x1ae   : > { %v2778_v21 = vpop.f32.mrf.mxu1 }
 0x1af   : > { %v5373_v33 = vadd.f32 %v2776_v25, %v2748_v27 }
 0x1b0   : > { %v2691_v44 = vpop.f32.mrf.mxu2 }
 0x1b1   : > { %v2720_v11 = vpop.f32.mrf.mxu3  ;;  %v2692_v20 = vadd.f32 %v2691_v44, %v5352_v12 }
 0x1b3   : > { %v2721_v34 = vadd.f32 %v2720_v11, %v2692_v20 }
 0x1b4   : > { %v2848_v56 = vpop.f32.mrf.mxu0 }
 0x1b5   : > { %v2750_v38 = vadd.f32 %v2749_v26, %v2721_v34 }
 0x1b6   : > { %v2877_v35 = vpop.f32.mrf.mxu1 }
 0x1b7   : > { %v5376_v7 = vadd.f32 %v2778_v21, %v2750_v38 }
 0x1b8   : > { %v2790_v39 = vpop.f32.mrf.mxu2 }
 0x1b9   : > { %v2819_v42 = vpop.f32.mrf.mxu3  ;;  %v2791_v36 = vadd.f32 %v2790_v39, %v5355_v17 }
 0x1bb   : > { %v2820_v19 = vadd.f32 %v2819_v42, %v2791_v36 }
 0x1bc   : > { %v2850_v23 = vpop.f32.mrf.mxu0 }
 0x1bd   : > { %v2849_v58 = vadd.f32 %v2848_v56, %v2820_v19 }
 0x1be   : > { %v2879_v52 = vpop.f32.mrf.mxu1 }
 0x1bf   : > { %v2878_v53 = vadd.f32 %v2877_v35, %v2849_v58 }
 0x1c0   : > { %v2792_v47 = vpop.f32.mrf.mxu2 }
 0x1c1   : > { %v2821_v48 = vpop.f32.mrf.mxu3  ;;  %v2793_v29 = vadd.f32 %v2792_v47, %v5358_v15 }
 0x1c3   : > { %v2822_v4 = vadd.f32 %v2821_v48, %v2793_v29 }
 0x1c4   : > { %v2853_v28 = vpop.f32.mrf.mxu0 }
 0x1c5   : > { %v2851_v25 = vadd.f32 %v2850_v23, %v2822_v4 }
 0x1c6   : > { %v2882_v30 = vpop.f32.mrf.mxu1 }
 0x1c7   : > { %v2880_v27 = vadd.f32 %v2879_v52, %v2851_v25 }
 0x1c8   : > { %v2795_v24 = vpop.f32.mrf.mxu2 }
 0x1c9   : > { %v2824_v55 = vpop.f32.mrf.mxu3  ;;  %v2796_v59 = vadd.f32 %v2795_v24, %v5361_v46 }
 0x1cb   : > { %v2825_v26 = vadd.f32 %v2824_v55, %v2796_v59 }
 0x1cc   : > { %v2855_v60 = vpop.f32.mrf.mxu0 }
 0x1cd   : > { %v2854_v20 = vadd.f32 %v2853_v28, %v2825_v26 }
 0x1ce   : > { %v5378_v61 = vpop.f32.mrf.mxu1 }
 0x1cf   : > { %v2883_v23 = vadd.f32 %v2882_v30, %v2854_v20 }
 0x1d0   : > { %v2797_v12 = vpop.f32.mrf.mxu2 }
 0x1d1   : > { %v2826_v8 = vpop.f32.mrf.mxu3  ;;  %v2798_v34 = vadd.f32 %v2797_v12, %v5364_v1 }
 0x1d3   : > { %v2827_v46 = vadd.f32 %v2826_v8, %v2798_v34 }
 0x1d4   : > { %v5380_v63 = vpop.f32.mrf.mxu0 }
 0x1d5   : > { %v2856_v24 = vadd.f32 %v2855_v60, %v2827_v46 }
 0x1d6   : > { %v5382_v37 = vpop.f32.mrf.mxu1 }
 0x1d7   : > { %v2885_v29 = vadd.f32 %v5378_v61, %v2856_v24 }
 0x1d8   : > { %v2800_v43 = vpop.f32.mrf.mxu2 }
 0x1d9   : > { %v2829_v57 = vpop.f32.mrf.mxu3  ;;  %v2801_v55 = vadd.f32 %v2800_v43, %v5367_v50 }
 0x1db   : > { %v2830_v1 = vadd.f32 %v2829_v57, %v2801_v55 }
 0x1dc   : > { %v5384_v45 = vpop.f32.mrf.mxu0 }
 0x1de   : > { %v5386_v0 = vpop.f32.mrf.mxu1 }
 0x1e0   : > { %v2802_v9 = vpop.f32.mrf.mxu2 }
 0x1e1   : > { %v5388_v6 = vpop.f32.mrf.mxu3  ;;  %v2803_v4 = vadd.f32 %v2802_v9, %v5370_v3 }
 0x1e3   : > { %v2832_v43 = vadd.f32 %v5388_v6, %v2803_v4 }
 0x1e4   : > { %v5390_v13 = vpop.f32.mrf.mxu0 }
 0x1e5   : > { %v2861_v59 = vadd.f32 %v5384_v45, %v2832_v43 }
 0x1e6   : > { %v5392_v5 = vpop.f32.mrf.mxu1 }
 0x1e8   : > { %v5394_v41 = vpop.f32.mrf.mxu2 }
 0x1e9   : > { %v5396_v22 = vpop.f32.mrf.mxu3 }
 0x1ec   : > { %v5399_v10 = vpop.f32.mrf.mxu0 }
 0x1ee   : > { %v5401_v62 = vpop.f32.mrf.mxu1 }
 0x1f0   : > { %v5403_v49 = vpop.f32.mrf.mxu2 }
 0x1f1   : > { %v5405_v31 = vpop.f32.mrf.mxu3  ;;  %v2808_v45 = vadd.f32 %v5403_v49, %v5376_v7 }
 0x1f4   : > { %v2964_v32 = vpop.f32.mrf.mxu0 }
 0x1f6   : > { %v2993_v51 = vpop.f32.mrf.mxu1 }
 0x1f8   : > { %v2906_v18 = vpop.f32.mrf.mxu2 }
 0x1f9   : > { %v2935_v54 = vpop.f32.mrf.mxu3  ;;  %v2907_v17 = vadd.f32 %v2906_v18, %v2878_v53 }
 0x1fb   : > { %v2936_v2 = vadd.f32 %v2935_v54, %v2907_v17 }
 0x1fc   : > { %v2966_v40 = vpop.f32.mrf.mxu0 }
 0x1fd   : > { %v2965_v16 = vadd.f32 %v2964_v32, %v2936_v2 }
 0x1fe   : > { %v2995_v14 = vpop.f32.mrf.mxu1 }
 0x1ff   : > { %v2994_v21 = vadd.f32 %v2993_v51, %v2965_v16  ;;  %v2859_v51 = vadd.f32 %v5380_v63, %v2830_v1  ;;  %v2806_v63 = vadd.f32 %v5394_v41, %v5373_v33 }
 0x200   : > { %v2908_v15 = vpop.f32.mrf.mxu2 }
 0x201   : > { %v2937_v44 = vpop.f32.mrf.mxu3  ;;  %3013 = vst [vmem:[%s4461_s25] sm:$0xff] %v2994_v21  ;;  %v2909_v11 = vadd.f32 %v2908_v15, %v2880_v27  ;;  %v2888_v57 = vadd.f32 %v5382_v37, %v2859_v51  ;;  %v2835_v2 = vadd.f32 %v5396_v22, %v2806_v63  ;;  %v2837_v22 = vadd.f32 %v5405_v31, %v2808_v45 }
 0x203   : > { %v2938_v56 = vadd.f32 %v2937_v44, %v2909_v11  ;;  %v2864_v27 = vadd.f32 %v5390_v13, %v2835_v2 }
 0x204   : > { %v2969_v35 = vpop.f32.mrf.mxu0 }
 0x205   : > { %v2967_v39 = vadd.f32 %v2966_v40, %v2938_v56  ;;  %v2893_v44 = vadd.f32 %v5392_v5, %v2864_v27  ;;  %v2866_v56 = vadd.f32 %v5399_v10, %v2837_v22 }
 0x206   : > { %v2998_v38 = vpop.f32.mrf.mxu1 }
 0x207   : > { %v2996_v42 = vadd.f32 %v2995_v14, %v2967_v39  ;;  %v2890_v14 = vadd.f32 %v5386_v0, %v2861_v59  ;;  %v2895_v49 = vadd.f32 %v5401_v62, %v2866_v56 }
 0x208   : > { %v2911_v47 = vpop.f32.mrf.mxu2  ;;  %v3072_v10 = vld [vmem:[%s4461_s25] sm:$0xff] (%p4450_p4) }
 0x209   : > { %v2940_v48 = vpop.f32.mrf.mxu3  ;;  %3014 = vst [vmem:[%s4461_s25 + $0x8] sm:$0xff] %v2996_v42  ;;  %v2912_v52 = vadd.f32 %v2911_v47, %v2883_v23 }
 0x20a   : > { %3073 = vst [vmem:[%s3029_s4] sm:$0xff] (%p4450_p4), %v3072_v10 }
 0x20b   : > { %v2941_v36 = vadd.f32 %v2940_v48, %v2912_v52 }
 0x20c   : > { %v2971_v19 = vpop.f32.mrf.mxu0 }
 0x20d   : > { %v2970_v28 = vadd.f32 %v2969_v35, %v2941_v36 }
 0x20e   : > { %v3000_v58 = vpop.f32.mrf.mxu1 }
 0x20f   : > { %v2999_v12 = vadd.f32 %v2998_v38, %v2970_v28 }
 0x210   : > { %v2913_v8 = vpop.f32.mrf.mxu2  ;;  %v3074_v62 = vld [vmem:[%s4461_s25 + $0x8] sm:$0xff] (%p4450_p4) }
 0x211   : > { %v2942_v32 = vpop.f32.mrf.mxu3  ;;  %3015 = vst [vmem:[%s4461_s25 + $0x10] sm:$0xff] %v2999_v12  ;;  %v2914_v30 = vadd.f32 %v2913_v8, %v2885_v29 }
 0x212   : > { %3075 = vst [vmem:[%s3029_s4 + $0x20] sm:$0xff] (%p4450_p4), %v3074_v62 }
 0x213   : > { %v2943_v60 = vadd.f32 %v2942_v32, %v2914_v30 }
 0x214   : > { %v2974_v50 = vpop.f32.mrf.mxu0 }
 0x215   : > { %v2972_v53 = vadd.f32 %v2971_v19, %v2943_v60 }
 0x216   : > { %v3003_v54 = vpop.f32.mrf.mxu1 }
 0x217   : > { %v3001_v18 = vadd.f32 %v3000_v58, %v2972_v53 }
 0x218   : > { %v2916_v61 = vpop.f32.mrf.mxu2  ;;  %v3076_v52 = vld [vmem:[%s4461_s25 + $0x10] sm:$0xff] (%p4450_p4) }
 0x219   : > { %v2945_v17 = vpop.f32.mrf.mxu3  ;;  %3016 = vst [vmem:[%s4461_s25 + $0x18] sm:$0xff] %v3001_v18  ;;  %v2917_v25 = vadd.f32 %v2916_v61, %v2888_v57 }
 0x21a   : > { %3077 = vst [vmem:[%s3029_s4 + $0x40] sm:$0xff] (%p4450_p4), %v3076_v52 }
 0x21b   : > { %v2946_v3 = vadd.f32 %v2945_v17, %v2917_v25 }
 0x21c   : > { %v2976_v6 = vpop.f32.mrf.mxu0 }
 0x21d   : > { %v2975_v9 = vadd.f32 %v2974_v50, %v2946_v3 }
 0x21e   : > { %v3005_v21 = vpop.f32.mrf.mxu1 }
 0x21f   : > { %v3004_v40 = vadd.f32 %v3003_v54, %v2975_v9 }
 0x220   : > { %v2918_v16 = vpop.f32.mrf.mxu2  ;;  %v3078_v24 = vld [vmem:[%s4461_s25 + $0x18] sm:$0xff] (%p4450_p4) }
 0x221   : > { %v2947_v37 = vpop.f32.mrf.mxu3  ;;  %3017 = vst [vmem:[%s4461_s25 + $0x20] sm:$0xff] %v3004_v40  ;;  %v2919_v26 = vadd.f32 %v2918_v16, %v2890_v14 }
 0x222   : > { %3079 = vst [vmem:[%s3029_s4 + $0x60] sm:$0xff] (%p4450_p4), %v3078_v24 }
 0x223   : > { %v2948_v33 = vadd.f32 %v2947_v37, %v2919_v26 }
 0x224   : > { %v2979_v34 = vpop.f32.mrf.mxu0 }
 0x225   : > { %v2977_v41 = vadd.f32 %v2976_v6, %v2948_v33 }
 0x226   : > { %v3008_v35 = vpop.f32.mrf.mxu1 }
 0x227   : > { %v3006_v15 = vadd.f32 %v3005_v21, %v2977_v41 }
 0x228   : > { %v2921_v11 = vpop.f32.mrf.mxu2  ;;  %v3080_v55 = vld [vmem:[%s4461_s25 + $0x20] sm:$0xff] (%p4450_p4) }
 0x229   : > { %v2950_v0 = vpop.f32.mrf.mxu3  ;;  %3018 = vst [vmem:[%s4461_s25 + $0x28] sm:$0xff] %v3006_v15  ;;  %v2922_v20 = vadd.f32 %v2921_v11, %v2893_v44 }
 0x22a   : > { %3081 = vst [vmem:[%s3029_s4 + $0x80] sm:$0xff] (%p4450_p4), %v3080_v55 }
 0x22b   : > { %v2951_v13 = vadd.f32 %v2950_v0, %v2922_v20 }
 0x22c   : > { %v2981_v5 = vpop.f32.mrf.mxu0 }
 0x22d   : > { %v2980_v38 = vadd.f32 %v2979_v34, %v2951_v13 }
 0x22e   : > { %v3010_v47 = vpop.f32.mrf.mxu1 }
 0x22f   : > { %v3009_v7 = vadd.f32 %v3008_v35, %v2980_v38 }
 0x230   : > { %v2923_v39 = vpop.f32.mrf.mxu2  ;;  %v3082_v36 = vld [vmem:[%s4461_s25 + $0x28] sm:$0xff] (%p4450_p4) }
 0x231   : > { %3019 = vst [vmem:[%s4461_s25 + $0x30] sm:$0xff] %v3009_v7  ;;  %v2924_v31 = vadd.f32 %v2923_v39, %v2895_v49  ;;  %v2952_v46 = vpop.f32.mrf.mxu3 }
 0x232   : > { %3083 = vst [vmem:[%s3029_s4 + $0xa0] sm:$0xff] (%p4450_p4), %v3082_v36 }
 0x233   : > { %v2953_v42 = vadd.f32 %v2952_v46, %v2924_v31 }
 0x235   : > { %v2982_v23 = vadd.f32 %v2981_v5, %v2953_v42  ;;  %3027 = sbr.rel (!%p4450_p4) target bundleno = 578 (0x242), region = 36 }
 0x237   : > { %v3011_v48 = vadd.f32 %v3010_v47, %v2982_v23 }
 0x238   : > { %v3084_v19 = vld [vmem:[%s4461_s25 + $0x30] sm:$0xff] (%p4450_p4) }
 0x239   : > { %3020 = vst [vmem:[%s4461_s25 + $0x38] sm:$0xff] %v3011_v48 }
 0x23a   : > { %3085 = vst [vmem:[%s3029_s4 + $0xc0] sm:$0xff] %v3084_v19 }
 0x240   : > { %v3086_v28 = vld [vmem:[%s4461_s25 + $0x38] sm:$0xff] }
 0x241   : > { %3087 = vst [vmem:[%s3029_s4 + $0xe0] sm:$0xff] %v3086_v28 }
 0x242 PF: > { %p9_p9 = scmp.ge.s32.totalorder %s4441_s13, 6   ;;  %s5466_s9 = smov %s4406_s10 }
 0x243   : > { %s5467_s10 = smov %s4448_s16  ;;  %s5468_s11 = smov %s4441_s13 }
 0x244   :  { %11 = sbr.rel (!%p9_p9) target bundleno = 2 (0x2), region = 110 }

</bundles_post_ra>
